<compile_context>
chip_gen: v5e
topology: v5e:2x2
jax: 0.10.0
libtpu: 0.0.40
codegen_flags: <defaults>
</compile_context>

<pallas_src>
import jax
import jax.numpy as jnp
from jax import lax
from jax.experimental import pallas as pl
from jax.experimental.pallas import tpu as pltpu
import numpy as np


def _bigru_kernel(gi_f_ref, gi_b_ref, len_ref, whh_ref, bhh_ref,
                  out_f_ref, out_b_ref, hfin_ref, h_scr):
    """One time chunk per grid step; fwd & bwd recurrences interleaved."""
    c = pl.program_id(0)
    n_chunks = pl.num_programs(0)
    C = gi_f_ref.shape[0]
    Hp = h_scr.shape[2]

    @pl.when(c == 0)
    def _():
        h_scr[...] = jnp.zeros_like(h_scr)

    whh_f = whh_ref[0]            # (Hp, 3Hp) recurrent weights (pre-transposed)
    whh_b = whh_ref[1]
    bhh_f = bhh_ref[0]            # (1, 3Hp)
    bhh_b = bhh_ref[1]
    lens = len_ref[...]           # (Bp, 1) int32 sequence lengths

    t0_f = c * C                              # first original timestep, fwd chunk
    t0_b = (n_chunks - 1 - c) * C             # first original timestep, bwd chunk

    def gru_cell(gi, h, whh, bhh, mask):
        gh = jnp.dot(h, whh, preferred_element_type=jnp.float32) + bhh
        r = jax.nn.sigmoid(gi[:, :Hp] + gh[:, :Hp])
        z = jax.nn.sigmoid(gi[:, Hp:2 * Hp] + gh[:, Hp:2 * Hp])
        n = jnp.tanh(gi[:, 2 * Hp:] + r * gh[:, 2 * Hp:])
        h_new = (1.0 - z) * n + z * h
        return jnp.where(mask, h_new, h)          # masked (padded) steps keep h

    def body(i, carry):
        h_f, h_b = carry
        j = C - 1 - i                             # bwd walks its chunk in reverse
        mask_f = (t0_f + i) < lens                # (Bp, 1) bool
        mask_b = (t0_b + j) < lens
        gi_f = gi_f_ref[i].astype(jnp.float32)    # bf16 stream -> f32 at use
        gi_b = gi_b_ref[j].astype(jnp.float32)
        h_f = gru_cell(gi_f, h_f, whh_f, bhh_f, mask_f)
        h_b = gru_cell(gi_b, h_b, whh_b, bhh_b, mask_b)
        out_f_ref[i] = jnp.where(mask_f, h_f, 0.0)   # padded steps emit zeros
        out_b_ref[j] = jnp.where(mask_b, h_b, 0.0)
        return h_f, h_b

    h_f, h_b = lax.fori_loop(0, C, body, (h_scr[0], h_scr[1]),
                             unroll=min(C, 8))
    h_scr[0] = h_f
    h_scr[1] = h_b

    @pl.when(c == n_chunks - 1)
    def _():
        hfin_ref[0] = h_f                          # final hidden, written once
        hfin_ref[1] = h_b


def _round_up(x, m):
    return (x + m - 1) // m * m


def encoder_rnn_forward(input_seq, input_lengths, embedding_table, params,
                        *, time_chunk=32, gi_dtype=jnp.bfloat16):
    """input_seq: (T, B) int32; input_lengths: (B,) int32 (max must equal T)."""
    T, B = input_seq.shape
    H = embedding_table.shape[1]
    Hp = _round_up(H, 128)            # lane-dense hidden size (per gate)
    Bp = _round_up(B, 8)              # sublane-dense batch
    C = min(time_chunk, T)
    Tp = _round_up(T, C)
    n_chunks = Tp // C

    # ---- glue (plain XLA): embedding gather + padding -----------------------
    emb = jnp.take(embedding_table, input_seq, axis=0).astype(jnp.float32)
    emb_p = jnp.zeros((Tp, Bp, Hp), jnp.float32).at[:T, :B, :H].set(emb)

    lens = jnp.zeros((Bp, 1), jnp.int32).at[:B, 0].set(
        input_lengths.astype(jnp.int32))

    # Pad PyTorch-layout GRU weights gate-by-gate so each gate occupies a
    # 128-aligned column block; pre-transpose for x @ W.  Padded rows/cols are
    # exactly zero (required for the padded-lane invariant).
    def pad_w(w):                      # (3H, H) -> (Hp, 3Hp)
        w3 = w.reshape(3, H, H).astype(jnp.float32)
        wp = jnp.zeros((Hp, 3 * Hp), jnp.float32)
        for g in range(3):
            wp = wp.at[:H, g * Hp:g * Hp + H].set(w3[g].T)
        return wp

    def pad_b(b):                      # (3H,) -> (1, 3Hp)
        b3 = b.reshape(3, H).astype(jnp.float32)
        bp = jnp.zeros((1, 3 * Hp), jnp.float32)
        for g in range(3):
            bp = bp.at[0, g * Hp:g * Hp + H].set(b3[g])
        return bp

    wih_f, whh_f = pad_w(params["wih_f"]), pad_w(params["whh_f"])
    wih_b, whh_b = pad_w(params["wih_b"]), pad_w(params["whh_b"])
    bih_f, bhh_f = pad_b(params["bih_f"]), pad_b(params["bhh_f"])
    bih_b, bhh_b = pad_b(params["bih_b"]), pad_b(params["bhh_b"])

    # ---- hoisted input projections: one large matmul per direction ----------
    # Both use the UN-flipped embeddings (timestep-independent projection);
    # the backward time order is handled entirely by index_maps + the kernel.
    gi_f = (jnp.dot(emb_p, wih_f, preferred_element_type=jnp.float32)
            + bih_f).astype(gi_dtype)
    gi_b = (jnp.dot(emb_p, wih_b, preferred_element_type=jnp.float32)
            + bih_b).astype(gi_dtype)

    whh = jnp.stack([whh_f, whh_b], axis=0)       # (2, Hp, 3Hp)
    bhh = jnp.stack([bhh_f, bhh_b], axis=0)       # (2, 1, 3Hp)

    # Explicit VMEM budget: double-buffered gi/out blocks + resident weights.
    gi_itemsize = jnp.dtype(gi_dtype).itemsize
    gi_block = C * Bp * 3 * Hp * gi_itemsize
    out_block = C * Bp * Hp * 4
    w_bytes = 2 * Hp * 3 * Hp * 4 + 2 * 3 * Hp * 4
    need = (2 * 2 * gi_block + 2 * 2 * out_block + 2 * w_bytes
            + 2 * (2 * Bp * Hp * 4) + 2 * Bp * Hp * 4 + (4 << 20))
    vmem_limit = int(min(max(need, 16 << 20), 64 << 20))

    grid_spec = pltpu.PrefetchScalarGridSpec(
        num_scalar_prefetch=0,
        grid=(n_chunks,),                          # time chunks (recurrence)
        in_specs=[
            pl.BlockSpec((C, Bp, 3 * Hp), lambda c: (c, 0, 0)),               # gi_f
            pl.BlockSpec((C, Bp, 3 * Hp), lambda c: (n_chunks - 1 - c, 0, 0)),  # gi_b (reversed chunks)
            pl.BlockSpec((Bp, 1), lambda c: (0, 0)),                          # lengths
            pl.BlockSpec((2, Hp, 3 * Hp), lambda c: (0, 0, 0)),               # whh
            pl.BlockSpec((2, 1, 3 * Hp), lambda c: (0, 0, 0)),                # bhh
        ],
        out_specs=[
            pl.BlockSpec((C, Bp, Hp), lambda c: (c, 0, 0)),                   # out_f
            pl.BlockSpec((C, Bp, Hp), lambda c: (n_chunks - 1 - c, 0, 0)),    # out_b (reversed chunks)
            pl.BlockSpec((2, Bp, Hp), lambda c: (0, 0, 0)),                   # final hidden
        ],
        scratch_shapes=[pltpu.VMEM((2, Bp, Hp), jnp.float32)],  # hidden carry
    )

    out_f, out_b, hfin = pl.pallas_call(
        _bigru_kernel,
        grid_spec=grid_spec,
        out_shape=(
            jax.ShapeDtypeStruct((Tp, Bp, Hp), jnp.float32),
            jax.ShapeDtypeStruct((Tp, Bp, Hp), jnp.float32),
            jax.ShapeDtypeStruct((2, Bp, Hp), jnp.float32),
        ),
        compiler_params=pltpu.CompilerParams(
            dimension_semantics=("arbitrary",),    # recurrence -> sequential
            vmem_limit_bytes=vmem_limit),
    )(gi_f, gi_b, lens, whh, bhh)

    outputs = (out_f + out_b)[:T, :B, :H]          # fwd + bwd, un-pad
    hidden = hfin[:, :B, :H]                       # (2, B, H)
    return outputs, hidden


# ---------------- pure-JAX reference (for correctness check) ----------------
def _gru_cell_ref(x, h, wih, whh, bih, bhh, H):
    gi = x @ wih.T + bih
    gh = h @ whh.T + bhh
    r = jax.nn.sigmoid(gi[:, :H] + gh[:, :H])
    z = jax.nn.sigmoid(gi[:, H:2 * H] + gh[:, H:2 * H])
    n = jnp.tanh(gi[:, 2 * H:] + r * gh[:, 2 * H:])
    return (1.0 - z) * n + z * h


def encoder_rnn_reference(input_seq, input_lengths, embedding_table, params):
    T, B = input_seq.shape
    H = embedding_table.shape[1]
    emb = jnp.take(embedding_table, input_seq, axis=0)
    lengths = input_lengths.astype(jnp.int32)

    h = jnp.zeros((B, H), jnp.float32)
    out_f = []
    for t in range(T):
        hn = _gru_cell_ref(emb[t], h, params["wih_f"], params["whh_f"],
                           params["bih_f"], params["bhh_f"], H)
        m = (t < lengths)[:, None]
        h = jnp.where(m, hn, h)
        out_f.append(jnp.where(m, h, 0.0))
    hf = h

    h = jnp.zeros((B, H), jnp.float32)
    out_b = [None] * T
    for t in reversed(range(T)):
        hn = _gru_cell_ref(emb[t], h, params["wih_b"], params["whh_b"],
                           params["bih_b"], params["bhh_b"], H)
        m = (t < lengths)[:, None]
        h = jnp.where(m, hn, h)
        out_b[t] = jnp.where(m, h, 0.0)
    hb = h

    outputs = jnp.stack(out_f) + jnp.stack(out_b)
    hidden = jnp.stack([hf, hb], axis=0)
    return outputs, hidden


if __name__ == "__main__":
    # Small shapes consistent with the module (hidden_size scaled down).
    T, B, H, V = 8, 2, 32, 50
    key = jax.random.PRNGKey(0)
    ks = jax.random.split(key, 11)
    bound = 1.0 / np.sqrt(H)
    u = lambda k, shape: jax.random.uniform(k, shape, jnp.float32, -bound, bound)

    embedding_table = u(ks[0], (V, H))
    params = {
        "wih_f": u(ks[1], (3 * H, H)), "whh_f": u(ks[2], (3 * H, H)),
        "bih_f": u(ks[3], (3 * H,)),   "bhh_f": u(ks[4], (3 * H,)),
        "wih_b": u(ks[5], (3 * H, H)), "whh_b": u(ks[6], (3 * H, H)),
        "bih_b": u(ks[7], (3 * H,)),   "bhh_b": u(ks[8], (3 * H,)),
    }

    input_seq = jax.random.randint(ks[9], (T, B), 0, V, dtype=jnp.int32)
    # pack_padded_sequence expects lengths sorted descending; max length == T.
    input_lengths = jnp.array([T, 5], dtype=jnp.int32)
    # TODO(synk): dropout is a no-op here (n_layers == 1, matching the module).

    ref_out, ref_hid = encoder_rnn_reference(input_seq, input_lengths,
                                             embedding_table, params)

    # Run 1: f32 streaming, time_chunk=3 -> 3 chunks with a padded time tail
    # (exercises cross-chunk hidden carry, reversed index_maps, Tp > T).
    out1, hid1 = encoder_rnn_forward(input_seq, input_lengths,
                                     embedding_table, params,
                                     time_chunk=3, gi_dtype=jnp.float32)
    out1 = jax.block_until_ready(out1)
    hid1 = jax.block_until_ready(hid1)
    np.testing.assert_allclose(np.asarray(out1), np.asarray(ref_out),
                               rtol=1e-5, atol=1e-5)
    np.testing.assert_allclose(np.asarray(hid1), np.asarray(ref_hid),
                               rtol=1e-5, atol=1e-5)

    # Run 2: default config (bf16 gi stream, single time chunk at T=8).
    out2, hid2 = encoder_rnn_forward(input_seq, input_lengths,
                                     embedding_table, params)
    out2 = jax.block_until_ready(out2)
    hid2 = jax.block_until_ready(hid2)
    np.testing.assert_allclose(np.asarray(out2), np.asarray(ref_out),
                               rtol=1e-2, atol=1e-2)
    np.testing.assert_allclose(np.asarray(hid2), np.asarray(ref_hid),
                               rtol=1e-2, atol=1e-2)

    assert out2.shape == (T, B, H) and hid2.shape == (2, B, H)
    print("KERNEL_OK")
</pallas_src>

<mosaic_0001>
module attributes {stable_mosaic.version = 11 : i64} {
  func.func @_bigru_kernel(%arg0: i32, %arg1: memref<3x8x384xf32, #tpu.memory_space<vmem>>, %arg2: memref<3x8x384xf32, #tpu.memory_space<vmem>>, %arg3: memref<8x1xi32, #tpu.memory_space<vmem>>, %arg4: memref<2x128x384xf32, #tpu.memory_space<vmem>>, %arg5: memref<2x1x384xf32, #tpu.memory_space<vmem>>, %arg6: memref<3x8x128xf32, #tpu.memory_space<vmem>>, %arg7: memref<3x8x128xf32, #tpu.memory_space<vmem>>, %arg8: memref<2x8x128xf32, #tpu.memory_space<vmem>>, %arg9: memref<2x8x128xf32, #tpu.memory_space<vmem>>) attributes {dimension_semantics = [#tpu.dimension_semantics<arbitrary>], iteration_bounds = array<i64: 3>, scalar_prefetch = 0 : i64, scratch_operands = 1 : i64, tpu.core_type = #tpu.core_type<tc>, window_params = [{transform_indices = @transform_0, window_bounds = array<i64: 3, 8, 384>}, {transform_indices = @transform_1, window_bounds = array<i64: 3, 8, 384>}, {pipeline_mode = #tpu.pipeline_mode<synchronous>, transform_indices = @transform_2, window_bounds = array<i64: 8, 1>}, {pipeline_mode = #tpu.pipeline_mode<synchronous>, transform_indices = @transform_3, window_bounds = array<i64: 2, 128, 384>}, {pipeline_mode = #tpu.pipeline_mode<synchronous>, transform_indices = @transform_4, window_bounds = array<i64: 2, 1, 384>}, {transform_indices = @transform_5, window_bounds = array<i64: 3, 8, 128>}, {transform_indices = @transform_6, window_bounds = array<i64: 3, 8, 128>}, {pipeline_mode = #tpu.pipeline_mode<synchronous>, transform_indices = @transform_7, window_bounds = array<i64: 2, 8, 128>}]} {
    %c0_i32 = arith.constant 0 : i32
    %0 = arith.cmpi eq, %arg0, %c0_i32 : i32
    %1 = arith.extui %0 : i1 to i32
    %c0_i32_0 = arith.constant 0 : i32
    %2 = arith.cmpi ne, %1, %c0_i32_0 : i32
    scf.if %2 {
      %cst_87 = arith.constant 0.000000e+00 : f32
      %307 = vector.broadcast %cst_87 : f32 to vector<2x8x128xf32>
      %c0_88 = arith.constant 0 : index
      %c0_89 = arith.constant 0 : index
      %c0_90 = arith.constant 0 : index
      %308 = vector.load %arg9[%c0_88, %c0_89, %c0_90] : memref<2x8x128xf32, #tpu.memory_space<vmem>>, vector<2x8x128xf32>
      tpu.vector_store %arg9[%c0_88, %c0_89, %c0_90], %307 {strides = array<i32>} : memref<2x8x128xf32, #tpu.memory_space<vmem>>, vector<2x8x128xf32>,
    } else {
    }
    %c0 = arith.constant 0 : index
    %c0_1 = arith.constant 0 : index
    %c0_2 = arith.constant 0 : index
    %3 = vector.load %arg4[%c0, %c0_1, %c0_2] : memref<2x128x384xf32, #tpu.memory_space<vmem>>, vector<1x128x384xf32>
    %4 = vector.shape_cast %3 : vector<1x128x384xf32> to vector<128x384xf32>
    %c1 = arith.constant 1 : index
    %c0_3 = arith.constant 0 : index
    %c0_4 = arith.constant 0 : index
    %5 = vector.load %arg4[%c1, %c0_3, %c0_4] : memref<2x128x384xf32, #tpu.memory_space<vmem>>, vector<1x128x384xf32>
    %6 = vector.shape_cast %5 : vector<1x128x384xf32> to vector<128x384xf32>
    %c0_5 = arith.constant 0 : index
    %c0_6 = arith.constant 0 : index
    %c0_7 = arith.constant 0 : index
    %7 = vector.load %arg5[%c0_5, %c0_6, %c0_7] : memref<2x1x384xf32, #tpu.memory_space<vmem>>, vector<1x1x384xf32>
    %8 = vector.shape_cast %7 : vector<1x1x384xf32> to vector<1x384xf32>
    %c1_8 = arith.constant 1 : index
    %c0_9 = arith.constant 0 : index
    %c0_10 = arith.constant 0 : index
    %9 = vector.load %arg5[%c1_8, %c0_9, %c0_10] : memref<2x1x384xf32, #tpu.memory_space<vmem>>, vector<1x1x384xf32>
    %10 = vector.shape_cast %9 : vector<1x1x384xf32> to vector<1x384xf32>
    %c0_11 = arith.constant 0 : index
    %c0_12 = arith.constant 0 : index
    %11 = vector.load %arg3[%c0_11, %c0_12] : memref<8x1xi32, #tpu.memory_space<vmem>>, vector<8x1xi32>
    %c3_i32 = arith.constant 3 : i32
    %12 = arith.muli %arg0, %c3_i32 : i32
    %c2_i32 = arith.constant 2 : i32
    %13 = arith.subi %c2_i32, %arg0 : i32
    %c3_i32_13 = arith.constant 3 : i32
    %14 = arith.muli %13, %c3_i32_13 : i32
    %c0_14 = arith.constant 0 : index
    %c0_15 = arith.constant 0 : index
    %c0_16 = arith.constant 0 : index
    %15 = vector.load %arg9[%c0_14, %c0_15, %c0_16] : memref<2x8x128xf32, #tpu.memory_space<vmem>>, vector<1x8x128xf32>
    %16 = vector.shape_cast %15 : vector<1x8x128xf32> to vector<8x128xf32>
    %c1_17 = arith.constant 1 : index
    %c0_18 = arith.constant 0 : index
    %c0_19 = arith.constant 0 : index
    %17 = vector.load %arg9[%c1_17, %c0_18, %c0_19] : memref<2x8x128xf32, #tpu.memory_space<vmem>>, vector<1x8x128xf32>
    %18 = vector.shape_cast %17 : vector<1x8x128xf32> to vector<8x128xf32>
    %c0_i32_20 = arith.constant 0 : i32
    %c2_i32_21 = arith.constant 2 : i32
    %19 = arith.subi %c2_i32_21, %c0_i32_20 : i32
    %20 = arith.addi %12, %c0_i32_20 : i32
    %21 = vector.broadcast %20 : i32 to vector<8x1xi32>
    %22 = arith.cmpi slt, %21, %11 : vector<8x1xi32>
    %23 = arith.addi %14, %19 : i32
    %24 = vector.broadcast %23 : i32 to vector<8x1xi32>
    %25 = arith.cmpi slt, %24, %11 : vector<8x1xi32>
    %26 = arith.index_cast %c0_i32_20 : i32 to index
    %c0_22 = arith.constant 0 : index
    %c0_23 = arith.constant 0 : index
    %27 = vector.load %arg1[%26, %c0_22, %c0_23] : memref<3x8x384xf32, #tpu.memory_space<vmem>>, vector<1x8x384xf32>
    %28 = vector.shape_cast %27 : vector<1x8x384xf32> to vector<8x384xf32>
    %29 = arith.index_cast %19 : i32 to index
    %c0_24 = arith.constant 0 : index
    %c0_25 = arith.constant 0 : index
    %30 = vector.load %arg2[%29, %c0_24, %c0_25] : memref<3x8x384xf32, #tpu.memory_space<vmem>>, vector<1x8x384xf32>
    %31 = vector.shape_cast %30 : vector<1x8x384xf32> to vector<8x384xf32>
    %cst = arith.constant dense<0.000000e+00> : vector<8x384xf32>
    %32 = tpu.matmul %16, %4, %cst {dimension_numbers = #tpu.dot_dimension_numbers<[1], [0], [0], [1], [0, 0, 1, 1], [], []>} : vector<8x128xf32>, vector<128x384xf32>, vector<8x384xf32> -> vector<8x384xf32>
    %33 = vector.broadcast %8 : vector<1x384xf32> to vector<8x384xf32>
    %34 = arith.addf %32, %33 : vector<8x384xf32>
    %35 = vector.extract_strided_slice %28 {offsets = [0, 0], sizes = [8, 128], strides = [1, 1]} : vector<8x384xf32> to vector<8x128xf32>
    %36 = vector.extract_strided_slice %34 {offsets = [0, 0], sizes = [8, 128], strides = [1, 1]} : vector<8x384xf32> to vector<8x128xf32>
    %37 = arith.addf %35, %36 : vector<8x128xf32>
    %38 = arith.negf %37 : vector<8x128xf32>
    %39 = math.exp %38 : vector<8x128xf32>
    %cst_26 = arith.constant 1.000000e+00 : f32
    %40 = vector.broadcast %cst_26 : f32 to vector<8x128xf32>
    %41 = arith.addf %40, %39 : vector<8x128xf32>
    %42 = arith.divf %40, %41 : vector<8x128xf32>
    %43 = vector.extract_strided_slice %28 {offsets = [0, 128], sizes = [8, 128], strides = [1, 1]} : vector<8x384xf32> to vector<8x128xf32>
    %44 = vector.extract_strided_slice %34 {offsets = [0, 128], sizes = [8, 128], strides = [1, 1]} : vector<8x384xf32> to vector<8x128xf32>
    %45 = arith.addf %43, %44 : vector<8x128xf32>
    %46 = arith.negf %45 : vector<8x128xf32>
    %47 = math.exp %46 : vector<8x128xf32>
    %cst_27 = arith.constant 1.000000e+00 : f32
    %48 = vector.broadcast %cst_27 : f32 to vector<8x128xf32>
    %49 = arith.addf %48, %47 : vector<8x128xf32>
    %50 = arith.divf %48, %49 : vector<8x128xf32>
    %51 = vector.extract_strided_slice %28 {offsets = [0, 256], sizes = [8, 128], strides = [1, 1]} : vector<8x384xf32> to vector<8x128xf32>
    %52 = vector.extract_strided_slice %34 {offsets = [0, 256], sizes = [8, 128], strides = [1, 1]} : vector<8x384xf32> to vector<8x128xf32>
    %53 = arith.mulf %42, %52 : vector<8x128xf32>
    %54 = arith.addf %51, %53 : vector<8x128xf32>
    %55 = math.tanh %54 : vector<8x128xf32>
    %cst_28 = arith.constant 1.000000e+00 : f32
    %56 = vector.broadcast %cst_28 : f32 to vector<8x128xf32>
    %57 = arith.subf %56, %50 : vector<8x128xf32>
    %58 = arith.mulf %57, %55 : vector<8x128xf32>
    %59 = arith.mulf %50, %16 : vector<8x128xf32>
    %60 = arith.addf %58, %59 : vector<8x128xf32>
    %61 = vector.shape_cast %22 : vector<8x1xi1> to vector<8x1xi1>
    %62 = vector.broadcast %61 : vector<8x1xi1> to vector<8x128xi1>
    %63 = arith.select %62, %60, %16 : vector<8x128xi1>, vector<8x128xf32>
    %cst_29 = arith.constant dense<0.000000e+00> : vector<8x384xf32>
    %64 = tpu.matmul %18, %6, %cst_29 {dimension_numbers = #tpu.dot_dimension_numbers<[1], [0], [0], [1], [0, 0, 1, 1], [], []>} : vector<8x128xf32>, vector<128x384xf32>, vector<8x384xf32> -> vector<8x384xf32>
    %65 = vector.broadcast %10 : vector<1x384xf32> to vector<8x384xf32>
    %66 = arith.addf %64, %65 : vector<8x384xf32>
    %67 = vector.extract_strided_slice %31 {offsets = [0, 0], sizes = [8, 128], strides = [1, 1]} : vector<8x384xf32> to vector<8x128xf32>
    %68 = vector.extract_strided_slice %66 {offsets = [0, 0], sizes = [8, 128], strides = [1, 1]} : vector<8x384xf32> to vector<8x128xf32>
    %69 = arith.addf %67, %68 : vector<8x128xf32>
    %70 = arith.negf %69 : vector<8x128xf32>
    %71 = math.exp %70 : vector<8x128xf32>
    %cst_30 = arith.constant 1.000000e+00 : f32
    %72 = vector.broadcast %cst_30 : f32 to vector<8x128xf32>
    %73 = arith.addf %72, %71 : vector<8x128xf32>
    %74 = arith.divf %72, %73 : vector<8x128xf32>
    %75 = vector.extract_strided_slice %31 {offsets = [0, 128], sizes = [8, 128], strides = [1, 1]} : vector<8x384xf32> to vector<8x128xf32>
    %76 = vector.extract_strided_slice %66 {offsets = [0, 128], sizes = [8, 128], strides = [1, 1]} : vector<8x384xf32> to vector<8x128xf32>
    %77 = arith.addf %75, %76 : vector<8x128xf32>
    %78 = arith.negf %77 : vector<8x128xf32>
    %79 = math.exp %78 : vector<8x128xf32>
    %cst_31 = arith.constant 1.000000e+00 : f32
    %80 = vector.broadcast %cst_31 : f32 to vector<8x128xf32>
    %81 = arith.addf %80, %79 : vector<8x128xf32>
    %82 = arith.divf %80, %81 : vector<8x128xf32>
    %83 = vector.extract_strided_slice %31 {offsets = [0, 256], sizes = [8, 128], strides = [1, 1]} : vector<8x384xf32> to vector<8x128xf32>
    %84 = vector.extract_strided_slice %66 {offsets = [0, 256], sizes = [8, 128], strides = [1, 1]} : vector<8x384xf32> to vector<8x128xf32>
    %85 = arith.mulf %74, %84 : vector<8x128xf32>
    %86 = arith.addf %83, %85 : vector<8x128xf32>
    %87 = math.tanh %86 : vector<8x128xf32>
    %cst_32 = arith.constant 1.000000e+00 : f32
    %88 = vector.broadcast %cst_32 : f32 to vector<8x128xf32>
    %89 = arith.subf %88, %82 : vector<8x128xf32>
    %90 = arith.mulf %89, %87 : vector<8x128xf32>
    %91 = arith.mulf %82, %18 : vector<8x128xf32>
    %92 = arith.addf %90, %91 : vector<8x128xf32>
    %93 = vector.shape_cast %25 : vector<8x1xi1> to vector<8x1xi1>
    %94 = vector.broadcast %93 : vector<8x1xi1> to vector<8x128xi1>
    %95 = arith.select %94, %92, %18 : vector<8x128xi1>, vector<8x128xf32>
    %cst_33 = arith.constant 0.000000e+00 : f32
    %96 = vector.shape_cast %22 : vector<8x1xi1> to vector<8x1xi1>
    %97 = vector.broadcast %96 : vector<8x1xi1> to vector<8x128xi1>
    %98 = vector.broadcast %cst_33 : f32 to vector<8x128xf32>
    %99 = arith.select %97, %63, %98 : vector<8x128xi1>, vector<8x128xf32>
    %100 = arith.index_cast %c0_i32_20 : i32 to index
    %c0_34 = arith.constant 0 : index
    %c0_35 = arith.constant 0 : index
    %101 = vector.load %arg6[%100, %c0_34, %c0_35] : memref<3x8x128xf32, #tpu.memory_space<vmem>>, vector<1x8x128xf32>
    %102 = vector.shape_cast %101 : vector<1x8x128xf32> to vector<8x128xf32>
    %103 = vector.shape_cast %99 : vector<8x128xf32> to vector<1x8x128xf32>
    tpu.vector_store %arg6[%100, %c0_34, %c0_35], %103 {strides = array<i32>} : memref<3x8x128xf32, #tpu.memory_space<vmem>>, vector<1x8x128xf32>,
    %cst_36 = arith.constant 0.000000e+00 : f32
    %104 = vector.shape_cast %25 : vector<8x1xi1> to vector<8x1xi1>
    %105 = vector.broadcast %104 : vector<8x1xi1> to vector<8x128xi1>
    %106 = vector.broadcast %cst_36 : f32 to vector<8x128xf32>
    %107 = arith.select %105, %95, %106 : vector<8x128xi1>, vector<8x128xf32>
    %108 = arith.index_cast %19 : i32 to index
    %c0_37 = arith.constant 0 : index
    %c0_38 = arith.constant 0 : index
    %109 = vector.load %arg7[%108, %c0_37, %c0_38] : memref<3x8x128xf32, #tpu.memory_space<vmem>>, vector<1x8x128xf32>
    %110 = vector.shape_cast %109 : vector<1x8x128xf32> to vector<8x128xf32>
    %111 = vector.shape_cast %107 : vector<8x128xf32> to vector<1x8x128xf32>
    tpu.vector_store %arg7[%108, %c0_37, %c0_38], %111 {strides = array<i32>} : memref<3x8x128xf32, #tpu.memory_space<vmem>>, vector<1x8x128xf32>,
    %c1_i32 = arith.constant 1 : i32
    %c2_i32_39 = arith.constant 2 : i32
    %112 = arith.subi %c2_i32_39, %c1_i32 : i32
    %113 = arith.addi %12, %c1_i32 : i32
    %114 = vector.broadcast %113 : i32 to vector<8x1xi32>
    %115 = arith.cmpi slt, %114, %11 : vector<8x1xi32>
    %116 = arith.addi %14, %112 : i32
    %117 = vector.broadcast %116 : i32 to vector<8x1xi32>
    %118 = arith.cmpi slt, %117, %11 : vector<8x1xi32>
    %119 = arith.index_cast %c1_i32 : i32 to index
    %c0_40 = arith.constant 0 : index
    %c0_41 = arith.constant 0 : index
    %120 = vector.load %arg1[%119, %c0_40, %c0_41] : memref<3x8x384xf32, #tpu.memory_space<vmem>>, vector<1x8x384xf32>
    %121 = vector.shape_cast %120 : vector<1x8x384xf32> to vector<8x384xf32>
    %122 = arith.index_cast %112 : i32 to index
    %c0_42 = arith.constant 0 : index
    %c0_43 = arith.constant 0 : index
    %123 = vector.load %arg2[%122, %c0_42, %c0_43] : memref<3x8x384xf32, #tpu.memory_space<vmem>>, vector<1x8x384xf32>
    %124 = vector.shape_cast %123 : vector<1x8x384xf32> to vector<8x384xf32>
    %cst_44 = arith.constant dense<0.000000e+00> : vector<8x384xf32>
    %125 = tpu.matmul %63, %4, %cst_44 {dimension_numbers = #tpu.dot_dimension_numbers<[1], [0], [0], [1], [0, 0, 1, 1], [], []>} : vector<8x128xf32>, vector<128x384xf32>, vector<8x384xf32> -> vector<8x384xf32>
    %126 = vector.broadcast %8 : vector<1x384xf32> to vector<8x384xf32>
    %127 = arith.addf %125, %126 : vector<8x384xf32>
    %128 = vector.extract_strided_slice %121 {offsets = [0, 0], sizes = [8, 128], strides = [1, 1]} : vector<8x384xf32> to vector<8x128xf32>
    %129 = vector.extract_strided_slice %127 {offsets = [0, 0], sizes = [8, 128], strides = [1, 1]} : vector<8x384xf32> to vector<8x128xf32>
    %130 = arith.addf %128, %129 : vector<8x128xf32>
    %131 = arith.negf %130 : vector<8x128xf32>
    %132 = math.exp %131 : vector<8x128xf32>
    %cst_45 = arith.constant 1.000000e+00 : f32
    %133 = vector.broadcast %cst_45 : f32 to vector<8x128xf32>
    %134 = arith.addf %133, %132 : vector<8x128xf32>
    %135 = arith.divf %133, %134 : vector<8x128xf32>
    %136 = vector.extract_strided_slice %121 {offsets = [0, 128], sizes = [8, 128], strides = [1, 1]} : vector<8x384xf32> to vector<8x128xf32>
    %137 = vector.extract_strided_slice %127 {offsets = [0, 128], sizes = [8, 128], strides = [1, 1]} : vector<8x384xf32> to vector<8x128xf32>
    %138 = arith.addf %136, %137 : vector<8x128xf32>
    %139 = arith.negf %138 : vector<8x128xf32>
    %140 = math.exp %139 : vector<8x128xf32>
    %cst_46 = arith.constant 1.000000e+00 : f32
    %141 = vector.broadcast %cst_46 : f32 to vector<8x128xf32>
    %142 = arith.addf %141, %140 : vector<8x128xf32>
    %143 = arith.divf %141, %142 : vector<8x128xf32>
    %144 = vector.extract_strided_slice %121 {offsets = [0, 256], sizes = [8, 128], strides = [1, 1]} : vector<8x384xf32> to vector<8x128xf32>
    %145 = vector.extract_strided_slice %127 {offsets = [0, 256], sizes = [8, 128], strides = [1, 1]} : vector<8x384xf32> to vector<8x128xf32>
    %146 = arith.mulf %135, %145 : vector<8x128xf32>
    %147 = arith.addf %144, %146 : vector<8x128xf32>
    %148 = math.tanh %147 : vector<8x128xf32>
    %cst_47 = arith.constant 1.000000e+00 : f32
    %149 = vector.broadcast %cst_47 : f32 to vector<8x128xf32>
    %150 = arith.subf %149, %143 : vector<8x128xf32>
    %151 = arith.mulf %150, %148 : vector<8x128xf32>
    %152 = arith.mulf %143, %63 : vector<8x128xf32>
    %153 = arith.addf %151, %152 : vector<8x128xf32>
    %154 = vector.shape_cast %115 : vector<8x1xi1> to vector<8x1xi1>
    %155 = vector.broadcast %154 : vector<8x1xi1> to vector<8x128xi1>
    %156 = arith.select %155, %153, %63 : vector<8x128xi1>, vector<8x128xf32>
    %cst_48 = arith.constant dense<0.000000e+00> : vector<8x384xf32>
    %157 = tpu.matmul %95, %6, %cst_48 {dimension_numbers = #tpu.dot_dimension_numbers<[1], [0], [0], [1], [0, 0, 1, 1], [], []>} : vector<8x128xf32>, vector<128x384xf32>, vector<8x384xf32> -> vector<8x384xf32>
    %158 = vector.broadcast %10 : vector<1x384xf32> to vector<8x384xf32>
    %159 = arith.addf %157, %158 : vector<8x384xf32>
    %160 = vector.extract_strided_slice %124 {offsets = [0, 0], sizes = [8, 128], strides = [1, 1]} : vector<8x384xf32> to vector<8x128xf32>
    %161 = vector.extract_strided_slice %159 {offsets = [0, 0], sizes = [8, 128], strides = [1, 1]} : vector<8x384xf32> to vector<8x128xf32>
    %162 = arith.addf %160, %161 : vector<8x128xf32>
    %163 = arith.negf %162 : vector<8x128xf32>
    %164 = math.exp %163 : vector<8x128xf32>
    %cst_49 = arith.constant 1.000000e+00 : f32
    %165 = vector.broadcast %cst_49 : f32 to vector<8x128xf32>
    %166 = arith.addf %165, %164 : vector<8x128xf32>
    %167 = arith.divf %165, %166 : vector<8x128xf32>
    %168 = vector.extract_strided_slice %124 {offsets = [0, 128], sizes = [8, 128], strides = [1, 1]} : vector<8x384xf32> to vector<8x128xf32>
    %169 = vector.extract_strided_slice %159 {offsets = [0, 128], sizes = [8, 128], strides = [1, 1]} : vector<8x384xf32> to vector<8x128xf32>
    %170 = arith.addf %168, %169 : vector<8x128xf32>
    %171 = arith.negf %170 : vector<8x128xf32>
    %172 = math.exp %171 : vector<8x128xf32>
    %cst_50 = arith.constant 1.000000e+00 : f32
    %173 = vector.broadcast %cst_50 : f32 to vector<8x128xf32>
    %174 = arith.addf %173, %172 : vector<8x128xf32>
    %175 = arith.divf %173, %174 : vector<8x128xf32>
    %176 = vector.extract_strided_slice %124 {offsets = [0, 256], sizes = [8, 128], strides = [1, 1]} : vector<8x384xf32> to vector<8x128xf32>
    %177 = vector.extract_strided_slice %159 {offsets = [0, 256], sizes = [8, 128], strides = [1, 1]} : vector<8x384xf32> to vector<8x128xf32>
    %178 = arith.mulf %167, %177 : vector<8x128xf32>
    %179 = arith.addf %176, %178 : vector<8x128xf32>
    %180 = math.tanh %179 : vector<8x128xf32>
    %cst_51 = arith.constant 1.000000e+00 : f32
    %181 = vector.broadcast %cst_51 : f32 to vector<8x128xf32>
    %182 = arith.subf %181, %175 : vector<8x128xf32>
    %183 = arith.mulf %182, %180 : vector<8x128xf32>
    %184 = arith.mulf %175, %95 : vector<8x128xf32>
    %185 = arith.addf %183, %184 : vector<8x128xf32>
    %186 = vector.shape_cast %118 : vector<8x1xi1> to vector<8x1xi1>
    %187 = vector.broadcast %186 : vector<8x1xi1> to vector<8x128xi1>
    %188 = arith.select %187, %185, %95 : vector<8x128xi1>, vector<8x128xf32>
    %cst_52 = arith.constant 0.000000e+00 : f32
    %189 = vector.shape_cast %115 : vector<8x1xi1> to vector<8x1xi1>
    %190 = vector.broadcast %189 : vector<8x1xi1> to vector<8x128xi1>
    %191 = vector.broadcast %cst_52 : f32 to vector<8x128xf32>
    %192 = arith.select %190, %156, %191 : vector<8x128xi1>, vector<8x128xf32>
    %193 = arith.index_cast %c1_i32 : i32 to index
    %c0_53 = arith.constant 0 : index
    %c0_54 = arith.constant 0 : index
    %194 = vector.load %arg6[%193, %c0_53, %c0_54] : memref<3x8x128xf32, #tpu.memory_space<vmem>>, vector<1x8x128xf32>
    %195 = vector.shape_cast %194 : vector<1x8x128xf32> to vector<8x128xf32>
    %196 = vector.shape_cast %192 : vector<8x128xf32> to vector<1x8x128xf32>
    tpu.vector_store %arg6[%193, %c0_53, %c0_54], %196 {strides = array<i32>} : memref<3x8x128xf32, #tpu.memory_space<vmem>>, vector<1x8x128xf32>,
    %cst_55 = arith.constant 0.000000e+00 : f32
    %197 = vector.shape_cast %118 : vector<8x1xi1> to vector<8x1xi1>
    %198 = vector.broadcast %197 : vector<8x1xi1> to vector<8x128xi1>
    %199 = vector.broadcast %cst_55 : f32 to vector<8x128xf32>
    %200 = arith.select %198, %188, %199 : vector<8x128xi1>, vector<8x128xf32>
    %201 = arith.index_cast %112 : i32 to index
    %c0_56 = arith.constant 0 : index
    %c0_57 = arith.constant 0 : index
    %202 = vector.load %arg7[%201, %c0_56, %c0_57] : memref<3x8x128xf32, #tpu.memory_space<vmem>>, vector<1x8x128xf32>
    %203 = vector.shape_cast %202 : vector<1x8x128xf32> to vector<8x128xf32>
    %204 = vector.shape_cast %200 : vector<8x128xf32> to vector<1x8x128xf32>
    tpu.vector_store %arg7[%201, %c0_56, %c0_57], %204 {strides = array<i32>} : memref<3x8x128xf32, #tpu.memory_space<vmem>>, vector<1x8x128xf32>,
    %c2_i32_58 = arith.constant 2 : i32
    %c2_i32_59 = arith.constant 2 : i32
    %205 = arith.subi %c2_i32_59, %c2_i32_58 : i32
    %206 = arith.addi %12, %c2_i32_58 : i32
    %207 = vector.broadcast %206 : i32 to vector<8x1xi32>
    %208 = arith.cmpi slt, %207, %11 : vector<8x1xi32>
    %209 = arith.addi %14, %205 : i32
    %210 = vector.broadcast %209 : i32 to vector<8x1xi32>
    %211 = arith.cmpi slt, %210, %11 : vector<8x1xi32>
    %212 = arith.index_cast %c2_i32_58 : i32 to index
    %c0_60 = arith.constant 0 : index
    %c0_61 = arith.constant 0 : index
    %213 = vector.load %arg1[%212, %c0_60, %c0_61] : memref<3x8x384xf32, #tpu.memory_space<vmem>>, vector<1x8x384xf32>
    %214 = vector.shape_cast %213 : vector<1x8x384xf32> to vector<8x384xf32>
    %215 = arith.index_cast %205 : i32 to index
    %c0_62 = arith.constant 0 : index
    %c0_63 = arith.constant 0 : index
    %216 = vector.load %arg2[%215, %c0_62, %c0_63] : memref<3x8x384xf32, #tpu.memory_space<vmem>>, vector<1x8x384xf32>
    %217 = vector.shape_cast %216 : vector<1x8x384xf32> to vector<8x384xf32>
    %cst_64 = arith.constant dense<0.000000e+00> : vector<8x384xf32>
    %218 = tpu.matmul %156, %4, %cst_64 {dimension_numbers = #tpu.dot_dimension_numbers<[1], [0], [0], [1], [0, 0, 1, 1], [], []>} : vector<8x128xf32>, vector<128x384xf32>, vector<8x384xf32> -> vector<8x384xf32>
    %219 = vector.broadcast %8 : vector<1x384xf32> to vector<8x384xf32>
    %220 = arith.addf %218, %219 : vector<8x384xf32>
    %221 = vector.extract_strided_slice %214 {offsets = [0, 0], sizes = [8, 128], strides = [1, 1]} : vector<8x384xf32> to vector<8x128xf32>
    %222 = vector.extract_strided_slice %220 {offsets = [0, 0], sizes = [8, 128], strides = [1, 1]} : vector<8x384xf32> to vector<8x128xf32>
    %223 = arith.addf %221, %222 : vector<8x128xf32>
    %224 = arith.negf %223 : vector<8x128xf32>
    %225 = math.exp %224 : vector<8x128xf32>
    %cst_65 = arith.constant 1.000000e+00 : f32
    %226 = vector.broadcast %cst_65 : f32 to vector<8x128xf32>
    %227 = arith.addf %226, %225 : vector<8x128xf32>
    %228 = arith.divf %226, %227 : vector<8x128xf32>
    %229 = vector.extract_strided_slice %214 {offsets = [0, 128], sizes = [8, 128], strides = [1, 1]} : vector<8x384xf32> to vector<8x128xf32>
    %230 = vector.extract_strided_slice %220 {offsets = [0, 128], sizes = [8, 128], strides = [1, 1]} : vector<8x384xf32> to vector<8x128xf32>
    %231 = arith.addf %229, %230 : vector<8x128xf32>
    %232 = arith.negf %231 : vector<8x128xf32>
    %233 = math.exp %232 : vector<8x128xf32>
    %cst_66 = arith.constant 1.000000e+00 : f32
    %234 = vector.broadcast %cst_66 : f32 to vector<8x128xf32>
    %235 = arith.addf %234, %233 : vector<8x128xf32>
    %236 = arith.divf %234, %235 : vector<8x128xf32>
    %237 = vector.extract_strided_slice %214 {offsets = [0, 256], sizes = [8, 128], strides = [1, 1]} : vector<8x384xf32> to vector<8x128xf32>
    %238 = vector.extract_strided_slice %220 {offsets = [0, 256], sizes = [8, 128], strides = [1, 1]} : vector<8x384xf32> to vector<8x128xf32>
    %239 = arith.mulf %228, %238 : vector<8x128xf32>
    %240 = arith.addf %237, %239 : vector<8x128xf32>
    %241 = math.tanh %240 : vector<8x128xf32>
    %cst_67 = arith.constant 1.000000e+00 : f32
    %242 = vector.broadcast %cst_67 : f32 to vector<8x128xf32>
    %243 = arith.subf %242, %236 : vector<8x128xf32>
    %244 = arith.mulf %243, %241 : vector<8x128xf32>
    %245 = arith.mulf %236, %156 : vector<8x128xf32>
    %246 = arith.addf %244, %245 : vector<8x128xf32>
    %247 = vector.shape_cast %208 : vector<8x1xi1> to vector<8x1xi1>
    %248 = vector.broadcast %247 : vector<8x1xi1> to vector<8x128xi1>
    %249 = arith.select %248, %246, %156 : vector<8x128xi1>, vector<8x128xf32>
    %cst_68 = arith.constant dense<0.000000e+00> : vector<8x384xf32>
    %250 = tpu.matmul %188, %6, %cst_68 {dimension_numbers = #tpu.dot_dimension_numbers<[1], [0], [0], [1], [0, 0, 1, 1], [], []>} : vector<8x128xf32>, vector<128x384xf32>, vector<8x384xf32> -> vector<8x384xf32>
    %251 = vector.broadcast %10 : vector<1x384xf32> to vector<8x384xf32>
    %252 = arith.addf %250, %251 : vector<8x384xf32>
    %253 = vector.extract_strided_slice %217 {offsets = [0, 0], sizes = [8, 128], strides = [1, 1]} : vector<8x384xf32> to vector<8x128xf32>
    %254 = vector.extract_strided_slice %252 {offsets = [0, 0], sizes = [8, 128], strides = [1, 1]} : vector<8x384xf32> to vector<8x128xf32>
    %255 = arith.addf %253, %254 : vector<8x128xf32>
    %256 = arith.negf %255 : vector<8x128xf32>
    %257 = math.exp %256 : vector<8x128xf32>
    %cst_69 = arith.constant 1.000000e+00 : f32
    %258 = vector.broadcast %cst_69 : f32 to vector<8x128xf32>
    %259 = arith.addf %258, %257 : vector<8x128xf32>
    %260 = arith.divf %258, %259 : vector<8x128xf32>
    %261 = vector.extract_strided_slice %217 {offsets = [0, 128], sizes = [8, 128], strides = [1, 1]} : vector<8x384xf32> to vector<8x128xf32>
    %262 = vector.extract_strided_slice %252 {offsets = [0, 128], sizes = [8, 128], strides = [1, 1]} : vector<8x384xf32> to vector<8x128xf32>
    %263 = arith.addf %261, %262 : vector<8x128xf32>
    %264 = arith.negf %263 : vector<8x128xf32>
    %265 = math.exp %264 : vector<8x128xf32>
    %cst_70 = arith.constant 1.000000e+00 : f32
    %266 = vector.broadcast %cst_70 : f32 to vector<8x128xf32>
    %267 = arith.addf %266, %265 : vector<8x128xf32>
    %268 = arith.divf %266, %267 : vector<8x128xf32>
    %269 = vector.extract_strided_slice %217 {offsets = [0, 256], sizes = [8, 128], strides = [1, 1]} : vector<8x384xf32> to vector<8x128xf32>
    %270 = vector.extract_strided_slice %252 {offsets = [0, 256], sizes = [8, 128], strides = [1, 1]} : vector<8x384xf32> to vector<8x128xf32>
    %271 = arith.mulf %260, %270 : vector<8x128xf32>
    %272 = arith.addf %269, %271 : vector<8x128xf32>
    %273 = math.tanh %272 : vector<8x128xf32>
    %cst_71 = arith.constant 1.000000e+00 : f32
    %274 = vector.broadcast %cst_71 : f32 to vector<8x128xf32>
    %275 = arith.subf %274, %268 : vector<8x128xf32>
    %276 = arith.mulf %275, %273 : vector<8x128xf32>
    %277 = arith.mulf %268, %188 : vector<8x128xf32>
    %278 = arith.addf %276, %277 : vector<8x128xf32>
    %279 = vector.shape_cast %211 : vector<8x1xi1> to vector<8x1xi1>
    %280 = vector.broadcast %279 : vector<8x1xi1> to vector<8x128xi1>
    %281 = arith.select %280, %278, %188 : vector<8x128xi1>, vector<8x128xf32>
    %cst_72 = arith.constant 0.000000e+00 : f32
    %282 = vector.shape_cast %208 : vector<8x1xi1> to vector<8x1xi1>
    %283 = vector.broadcast %282 : vector<8x1xi1> to vector<8x128xi1>
    %284 = vector.broadcast %cst_72 : f32 to vector<8x128xf32>
    %285 = arith.select %283, %249, %284 : vector<8x128xi1>, vector<8x128xf32>
    %286 = arith.index_cast %c2_i32_58 : i32 to index
    %c0_73 = arith.constant 0 : index
    %c0_74 = arith.constant 0 : index
    %287 = vector.load %arg6[%286, %c0_73, %c0_74] : memref<3x8x128xf32, #tpu.memory_space<vmem>>, vector<1x8x128xf32>
    %288 = vector.shape_cast %287 : vector<1x8x128xf32> to vector<8x128xf32>
    %289 = vector.shape_cast %285 : vector<8x128xf32> to vector<1x8x128xf32>
    tpu.vector_store %arg6[%286, %c0_73, %c0_74], %289 {strides = array<i32>} : memref<3x8x128xf32, #tpu.memory_space<vmem>>, vector<1x8x128xf32>,
    %cst_75 = arith.constant 0.000000e+00 : f32
    %290 = vector.shape_cast %211 : vector<8x1xi1> to vector<8x1xi1>
    %291 = vector.broadcast %290 : vector<8x1xi1> to vector<8x128xi1>
    %292 = vector.broadcast %cst_75 : f32 to vector<8x128xf32>
    %293 = arith.select %291, %281, %292 : vector<8x128xi1>, vector<8x128xf32>
    %294 = arith.index_cast %205 : i32 to index
    %c0_76 = arith.constant 0 : index
    %c0_77 = arith.constant 0 : index
    %295 = vector.load %arg7[%294, %c0_76, %c0_77] : memref<3x8x128xf32, #tpu.memory_space<vmem>>, vector<1x8x128xf32>
    %296 = vector.shape_cast %295 : vector<1x8x128xf32> to vector<8x128xf32>
    %297 = vector.shape_cast %293 : vector<8x128xf32> to vector<1x8x128xf32>
    tpu.vector_store %arg7[%294, %c0_76, %c0_77], %297 {strides = array<i32>} : memref<3x8x128xf32, #tpu.memory_space<vmem>>, vector<1x8x128xf32>,
    %c3_i32_78 = arith.constant 3 : i32
    %c0_79 = arith.constant 0 : index
    %c0_80 = arith.constant 0 : index
    %c0_81 = arith.constant 0 : index
    %298 = vector.load %arg9[%c0_79, %c0_80, %c0_81] : memref<2x8x128xf32, #tpu.memory_space<vmem>>, vector<1x8x128xf32>
    %299 = vector.shape_cast %298 : vector<1x8x128xf32> to vector<8x128xf32>
    %300 = vector.shape_cast %249 : vector<8x128xf32> to vector<1x8x128xf32>
    tpu.vector_store %arg9[%c0_79, %c0_80, %c0_81], %300 {strides = array<i32>} : memref<2x8x128xf32, #tpu.memory_space<vmem>>, vector<1x8x128xf32>,
    %c1_82 = arith.constant 1 : index
    %c0_83 = arith.constant 0 : index
    %c0_84 = arith.constant 0 : index
    %301 = vector.load %arg9[%c1_82, %c0_83, %c0_84] : memref<2x8x128xf32, #tpu.memory_space<vmem>>, vector<1x8x128xf32>
    %302 = vector.shape_cast %301 : vector<1x8x128xf32> to vector<8x128xf32>
    %303 = vector.shape_cast %281 : vector<8x128xf32> to vector<1x8x128xf32>
    tpu.vector_store %arg9[%c1_82, %c0_83, %c0_84], %303 {strides = array<i32>} : memref<2x8x128xf32, #tpu.memory_space<vmem>>, vector<1x8x128xf32>,
    %c2_i32_85 = arith.constant 2 : i32
    %304 = arith.cmpi eq, %arg0, %c2_i32_85 : i32
    %305 = arith.extui %304 : i1 to i32
    %c0_i32_86 = arith.constant 0 : i32
    %306 = arith.cmpi ne, %305, %c0_i32_86 : i32
    scf.if %306 {
      %c0_87 = arith.constant 0 : index
      %c0_88 = arith.constant 0 : index
      %c0_89 = arith.constant 0 : index
      %307 = vector.load %arg8[%c0_87, %c0_88, %c0_89] : memref<2x8x128xf32, #tpu.memory_space<vmem>>, vector<1x8x128xf32>
      %308 = vector.shape_cast %307 : vector<1x8x128xf32> to vector<8x128xf32>
      %309 = vector.shape_cast %249 : vector<8x128xf32> to vector<1x8x128xf32>
      tpu.vector_store %arg8[%c0_87, %c0_88, %c0_89], %309 {strides = array<i32>} : memref<2x8x128xf32, #tpu.memory_space<vmem>>, vector<1x8x128xf32>,
      %c1_90 = arith.constant 1 : index
      %c0_91 = arith.constant 0 : index
      %c0_92 = arith.constant 0 : index
      %310 = vector.load %arg8[%c1_90, %c0_91, %c0_92] : memref<2x8x128xf32, #tpu.memory_space<vmem>>, vector<1x8x128xf32>
      %311 = vector.shape_cast %310 : vector<1x8x128xf32> to vector<8x128xf32>
      %312 = vector.shape_cast %281 : vector<8x128xf32> to vector<1x8x128xf32>
      tpu.vector_store %arg8[%c1_90, %c0_91, %c0_92], %312 {strides = array<i32>} : memref<2x8x128xf32, #tpu.memory_space<vmem>>, vector<1x8x128xf32>,
    } else {
    }
    return
  }
  func.func @transform_0(%arg0: i32) -> (i32, i32, i32) {
    %c0_i32 = arith.constant 0 : i32
    %c0_i32_0 = arith.constant 0 : i32
    %c0_i32_1 = arith.constant 0 : i32
    return %arg0, %c0_i32, %c0_i32_0 : i32, i32, i32
  }
  func.func @transform_1(%arg0: i32) -> (i32, i32, i32) {
    %c2_i32 = arith.constant 2 : i32
    %0 = arith.subi %c2_i32, %arg0 : i32
    %c0_i32 = arith.constant 0 : i32
    %c0_i32_0 = arith.constant 0 : i32
    %c0_i32_1 = arith.constant 0 : i32
    return %0, %c0_i32, %c0_i32_0 : i32, i32, i32
  }
  func.func @transform_2(%arg0: i32) -> (i32, i32) {
    %c0_i32 = arith.constant 0 : i32
    %c0_i32_0 = arith.constant 0 : i32
    %c0_i32_1 = arith.constant 0 : i32
    return %c0_i32, %c0_i32_0 : i32, i32
  }
  func.func @transform_3(%arg0: i32) -> (i32, i32, i32) {
    %c0_i32 = arith.constant 0 : i32
    %c0_i32_0 = arith.constant 0 : i32
    %c0_i32_1 = arith.constant 0 : i32
    %c0_i32_2 = arith.constant 0 : i32
    return %c0_i32, %c0_i32_0, %c0_i32_1 : i32, i32, i32
  }
  func.func @transform_4(%arg0: i32) -> (i32, i32, i32) {
    %c0_i32 = arith.constant 0 : i32
    %c0_i32_0 = arith.constant 0 : i32
    %c0_i32_1 = arith.constant 0 : i32
    %c0_i32_2 = arith.constant 0 : i32
    return %c0_i32, %c0_i32_0, %c0_i32_1 : i32, i32, i32
  }
  func.func @transform_5(%arg0: i32) -> (i32, i32, i32) {
    %c0_i32 = arith.constant 0 : i32
    %c0_i32_0 = arith.constant 0 : i32
    %c0_i32_1 = arith.constant 0 : i32
    return %arg0, %c0_i32, %c0_i32_0 : i32, i32, i32
  }
  func.func @transform_6(%arg0: i32) -> (i32, i32, i32) {
    %c2_i32 = arith.constant 2 : i32
    %0 = arith.subi %c2_i32, %arg0 : i32
    %c0_i32 = arith.constant 0 : i32
    %c0_i32_0 = arith.constant 0 : i32
    %c0_i32_1 = arith.constant 0 : i32
    return %0, %c0_i32, %c0_i32_0 : i32, i32, i32
  }
  func.func @transform_7(%arg0: i32) -> (i32, i32, i32) {
    %c0_i32 = arith.constant 0 : i32
    %c0_i32_0 = arith.constant 0 : i32
    %c0_i32_1 = arith.constant 0 : i32
    %c0_i32_2 = arith.constant 0 : i32
    return %c0_i32, %c0_i32_0, %c0_i32_1 : i32, i32, i32
  }
}

</mosaic_0001>

<bundles_post_ra>
// kernel: tpu_custom_call.1
= control target key start
LH: loop header
LB: loop body
LE: loop exit
PB: predicated region body
PF: predicated region fallthrough
CT: control target
= control target key end

     0   :  { %s2920_s0 = inlined_call_operand.hbm [shape: f32[9,8,384], index: 0, kind: input, shape index: {}]   ;;  %s2921_s1 = inlined_call_operand.hbm [shape: f32[9,8,384], index: 1, kind: input, shape index: {}]   ;;  %s2922_s2 = inlined_call_operand.vmem [shape: s32[8,1], index: 2, kind: input, shape index: {}]   ;;  %s2923_s3 = inlined_call_operand.hbm [shape: f32[2,128,384], index: 3, kind: input, shape index: {}]   ;;  %s2924_s4 = inlined_call_operand.vmem [shape: f32[2,1,384], index: 4, kind: input, shape index: {}]   ;;  %s2925_s5 = inlined_call_operand.hbm [shape: f32[9,8,128], index: 5, kind: output, shape index: {0}]   ;;  %s2926_s6 = inlined_call_operand.hbm [shape: f32[9,8,128], index: 6, kind: output, shape index: {1}]   ;;  %s2927_s7 = inlined_call_operand.hbm [shape: f32[2,8,128], index: 7, kind: output, shape index: {2}]  }
   0x1   :  { %3039 = sst [smem:[#allocation86_spill]] %s2920_s0 }
   0x2   :  { %3040 = sst [smem:[#allocation87_spill]] %s2923_s3 }
   0x3   :  { %3041 = sst [smem:[#allocation88_spill]] %s2927_s7 }
   0x4   :  { %13 = vsyncpa [#allocation4], 0 }
   0x5   :  { %15 = vsyncpa [#allocation4 + $0x1], 0 }
   0x6   :  { %16 = vsyncpa [#allocation7], 0 }
   0x7   :  { %18 = vsyncpa [#allocation7 + $0x1], 0 }
   0x8   :  { %19 = vsyncpa [#allocation5], 0 }
   0x9   :  { %21 = vsyncpa [#allocation5 + $0x1], 0 }
   0xa   :  { %22 = vsyncpa [#allocation11], 0 }
   0xb   :  { %24 = vsyncpa [#allocation11 + $0x1], 0  ;;  %s1974_s24 = smov 0   ;;  %s1976_s25 = smov 0  }
   0xc   :  { %s1978_s26 = smov 0   ;;  %s1980_s27 = smov 0  }
   0xd   :  { %s1982_s28 = smov 0   ;;  %s1984_s29 = smov 0  }
   0xe   :  { %s1986_s30 = smov 0  }
   0xf LB: > { %3042 = sst [smem:[#allocation19_spill]] %s1908_s26  ;;  %s2010_s8 = sadd.s32 4294967295, %s1924_s30   ;;  %s1924_s30 = sphi %s1986_s30, %s3221_s30   ;;  %s1920_s29 = sphi %s1984_s29, %s3225_s29   ;;  %s1916_s28 = sphi %s1982_s28, %s3229_s28   ;;  %s1912_s27 = sphi %s1980_s27, %s3228_s27   ;;  %s1908_s26 = sphi %s1978_s26, %s3223_s26   ;;  %s1904_s25 = sphi %s1976_s25, %s3227_s25   ;;  %s1900_s24 = sphi %s1974_s24, %s3226_s24  }
  0x10   : > { %3043 = sst [smem:[#allocation20_spill]] %s1912_s27  ;;  %p2928_p0 = scmp.ne.s32.totalorder %s1904_s25, %s1900_s24 }
  0x11   : > { %3044 = sst [smem:[#allocation21_spill]] %s1920_s29  ;;  %p2940_p1 = scmp.eq.s32.totalorder %s2010_s8, 0 }
  0x12   : > { %3045 = sst [smem:[#allocation22_spill]] %s1924_s30  ;;  %p2929_p2 = scmp.eq.s32.totalorder %s2010_s8, 2 }
  0x13   : > { %p1449_p3 = scmp.ge.s32.totalorder %s1924_s30, 1  ;;  %p227_p4 = scmp.lt.s32.totalorder %s1924_s30, 4 }
  0x14   : > { %p2023_p5 = por %p2928_p0, %p2940_p1  ;;  %s3048_s3 = sld [smem:[#allocation87_spill]] }
  0x15   : > { %p2028_p7 = pnand %p1449_p3, %p227_p4  ;;  %s1926_s14 = smov [#allocation8]  }
  0x16   : > { %s243_s15 = sshll.u32 %s1926_s14, 4  ;;  %s2931_s16 = smov 384   ;;  %s244_s15 = int_to_ptr.vmem [resolvable:$true] %s243_s15 }
  0x17   : > { %p1519_p8 = pneg %p2028_p7  ;;  %s2933_s17 = smov 24  }
  0x18   : > { %s2935_s18 = sadd.s32 4294967294, %s1924_s30   ;;  %s2044_s19 = sadd.s32 1, %s1924_s30  }
  0x19   : > { %p1520_p9 = pnand %p1519_p8, %p2940_p1  ;;  %3049 = sst [smem:[#allocation23_spill]] %s2044_s19 }
  0x1a   : > { %s241_s13 = sshll.u32 %s3048_s3, 4  ;;  %s37_s20 = sadd.s32 1, %s1920_s29  ;;  %s242_s13 = int_to_ptr.hbm [resolvable:$true] %s241_s13 }
  0x1b   : > { %1522 = dma.hbm_to_vmem [thread:$0]  (!%p1520_p9), %s242_s13, 12288, %s244_s15, [#allocation7], %s2931_s16, %s2931_s16, %s2933_s17  }
  0x1c   : > { %s34_s21 = ssub.s32 %s1924_s30, %s2044_s19  ;;  %p44_p10 = scmp.ne.s32.totalorder %s1920_s29, %s1916_s28 }
  0x1d   : > { %p35_p11 = scmp.eq.s32.totalorder %s34_s21, 0  ;;  %p2942_p12 = scmp.eq.s32.totalorder %s1924_s30, 0 }
  0x1e   : > { %p50_p13 = scmp.ne.s32.totalorder %s1916_s28, %s1912_s27  ;;  %p2056_p3 = por %p2929_p2, %p44_p10 }
  0x1f   : > { %s2061_s23 = scalar_select %p35_p11, %s1920_s29, %s37_s20  }
  0x20   : > { %s3050_s22 = scalar_select %p2056_p3, 1, 0 }
  0x21   : > { %3051 = sst [smem:[#allocation24_spill]] %s2061_s23  ;;  %p46_p4 = por %p2942_p12, %p44_p10 }
  0x22   : > { %p2067_p8 = por %p2940_p1, %p50_p13  ;;  %p171_p9 = scmp.eq.s32.totalorder %s2935_s18, 2 }
  0x23   : > { %p2941_p6 = scmp.lt.s32.totalorder %s1924_s30, 3  ;;  %s260_s12 = sand.u32 1, %s1920_s29  }
  0x24   : > { %s1539_s13 = smul.u32 72, %s1924_s30  ;;  %p2076_p0 = por %p171_p9, %p50_p13 }
  0x25   : > { %p3055_p2 = scmp.ne.s32.totalorder %s1904_s25, %s1900_s24  ;;  %s1495_s20 = smul.u32 72, %s260_s12 }
  0x26   : > { %s3053_s14 = scalar_select %p2076_p0, 1, 0 }
  0x27   : > { %p2083_p3 = por %p171_p9, %p3055_p2  ;;  %s3058_s0 = sld [smem:[#allocation86_spill]] }
  0x28   : > { %3054 = sst [smem:[#allocation25_spill]] %s3053_s14  ;;  %p2092_p10 = pnand %p2941_p6, %p46_p4 }
  0x29   : > { %s3056_s15 = scalar_select %p2083_p3, 1, 0 }
  0x2a   : > { %s264_s23 = scalar_lea.vmem [#allocation3], %s1495_s20  ;;  %s261_s24 = scalar_lea.sflag [#allocation4], %s260_s12 }
  0x2b   : > { %3057 = sst [smem:[#allocation26_spill]] %s3056_s15  ;;  %s273_s29 = sshll.u32 %s264_s23, 4  ;;  %s274_s29 = int_to_ptr.vmem [resolvable:$true] %s273_s29 }
  0x2c   : > { %p1706_p11 = pneg %p2092_p10 }
  0x2d   : > { %s270_s17 = scalar_lea.hbm %s3058_s0, %s1539_s13  ;;  %s1709_s21 = scalar_lea.hbm %s3058_s0, 216 }
  0x2e   : > { %s271_s3 = sshll.u32 %s270_s17, 4  ;;  %s272_s3 = int_to_ptr.hbm [resolvable:$true] %s271_s3 }
  0x2f   : > { %s1702_s14 = sshra.s32 %s272_s3, 4  ;;  %s1703_s14 = int_to_ptr.hbm [resolvable:$true] %s1702_s14 }
  0x30   : > { %s1704_s15 = scalar_lea.hbm %s1703_s14, 72  ;;  %p1710_p4 = scmp.lt.s32.totalorder %s1703_s14, %s3058_s0 }
  0x31   : > { %p1705_p2 = scmp.ne.s32.totalorder %s1703_s14, %s1704_s15  ;;  %p1711_p1 = scmp.lt.s32.totalorder %s1709_s21, %s1704_s15 }
  0x33   : > { %p1707_p13 = pnand %p1706_p11, %p1705_p2  ;;  %p1712_p6 = por %p1711_p1, %p1710_p4 }
  0x35   : > { %p1708_p9 = pneg %p1707_p13 }
  0x37   : > { %p1713_p12 = pnand %p1712_p6, %p1708_p9 }
  0x39   : > { %1716 = shalt.err (!%p1713_p12)
}
  0x3a   : > { %s3060_s17 = smov 24   ;;  %s3061_s23 = smov 384  }
  0x3b   : > { %1526 = dma.hbm_to_vmem [thread:$0]  (!%p2092_p10), %s272_s3, 1152, %s274_s29, %s261_s24, %s3061_s23, %s3061_s23, %s3060_s17  }
  0x3c   : > { %s60_s7 = ssub.s32 2, %s1924_s30  ;;  %s61_s27 = ssub.s32 2, %s2044_s19 }
  0x3d   : > { %s62_s12 = ssub.s32 %s60_s7, %s61_s27  ;;  %s65_s14 = sadd.s32 1, %s1908_s26 }
  0x3e   : > { %p63_p1 = scmp.eq.s32.totalorder %s62_s12, 0  ;;  %p72_p6 = scmp.ne.s32.totalorder %s1908_s26, %s1904_s25 }
  0x3f   : > { %s283_s18 = sand.u32 1, %s1924_s30   ;;  %s285_s15 = sand.u32 1, %s1908_s26  }
  0x40   : > { %s2117_s20 = scalar_select %p63_p1, %s1908_s26, %s65_s14  }
  0x41   : > { %p3063_p12 = scmp.eq.s32.totalorder %s1924_s30, 0  ;;  %p3064_p11 = scmp.eq.s32.totalorder %s2010_s8, 2 }
  0x42   : > { %3062 = sst [smem:[#allocation27_spill]] %s2117_s20  ;;  %s1497_s13 = smul.u32 72, %s285_s15 }
  0x43   : > { %p74_p2 = por %p72_p6, %p3063_p12  ;;  %p2123_p13 = por %p3064_p11, %p72_p6 }
  0x44   : > { %p3066_p9 = scmp.lt.s32.totalorder %s1924_s30, 3  ;;  %s1540_s29 = smul.u32 72, %s60_s7 }
  0x45   : > { %s287_s24 = scalar_lea.vmem [#allocation6], %s1497_s13  ;;  %s284_s20 = scalar_lea.sflag [#allocation7], %s283_s18 }
  0x46   : > { %p2129_p10 = pnand %p3066_p9, %p74_p2  ;;  %s297_s21 = sshll.u32 %s287_s24, 4  ;;  %s298_s21 = int_to_ptr.vmem [resolvable:$true] %s297_s21 }
  0x47   : > { %s294_s14 = scalar_lea.hbm %s2921_s1, %s1540_s29  ;;  %s1739_s13 = scalar_lea.hbm %s2921_s1, 216 }
  0x48   : > { %s295_s0 = sshll.u32 %s294_s14, 4  ;;  %p1736_p1 = pneg %p2129_p10  ;;  %s296_s0 = int_to_ptr.hbm [resolvable:$true] %s295_s0 }
  0x49   : > { %s1732_s26 = sshra.s32 %s296_s0, 4  ;;  %s1733_s26 = int_to_ptr.hbm [resolvable:$true] %s1732_s26 }
  0x4a   : > { %s1734_s15 = scalar_lea.hbm %s1733_s26, 72  ;;  %p1740_p2 = scmp.lt.s32.totalorder %s1733_s26, %s2921_s1 }
  0x4b   : > { %p1735_p4 = scmp.ne.s32.totalorder %s1733_s26, %s1734_s15  ;;  %p1741_p11 = scmp.lt.s32.totalorder %s1739_s13, %s1734_s15 }
  0x4d   : > { %p1737_p6 = pnand %p1736_p1, %p1735_p4  ;;  %p1742_p9 = por %p1741_p11, %p1740_p2 }
  0x4f   : > { %p1738_p12 = pneg %p1737_p6 }
  0x51   : > { %p1743_p3 = pnand %p1742_p9, %p1738_p12 }
  0x53   : > { %1746 = shalt.err (!%p1743_p3)
}
  0x54   : > { %1529 = dma.hbm_to_vmem [thread:$0]  (!%p2129_p10), %s296_s0, 1152, %s298_s21, %s284_s20, %s3061_s23, %s3061_s23, %s3060_s17  }
  0x55   : > { %309 = sbr.rel (%p2028_p7) target bundleno = 742 (0x2e6), region = 40 }
  0x5a   : > { %s2152_s19 = sand.u32 1, %s1916_s28  }
  0x5b   : > { %s1499_s26 = smul.u32 72, %s2152_s19  ;;  %s312_s30 = scalar_lea.sflag [#allocation4], %s2152_s19 }
  0x5d   : > { %s2156_s18 = scalar_lea.vmem [#allocation3], %s1499_s26 }
  0x5e   : > { %1875 = dma.done.wait (%p2067_p8), %s312_s30, 1152  }
  0x5f   : > { %1877 = vsyncadd (%p2067_p8), %s312_s30, 4294966144  ;;  %s321_s0 = sand.u32 1, %s2010_s8   ;;  %s323_s10 = sand.u32 1, %s1904_s25  }
  0x60   : > { %s1500_s17 = smul.u32 72, %s323_s10  ;;  %s322_s23 = scalar_lea.sflag [#allocation7], %s321_s0 }
  0x62   : > { %s2166_s20 = scalar_lea.vmem [#allocation6], %s1500_s17 }
  0x63   : > { %1879 = dma.done.wait (%p2023_p5), %s322_s23, 1152  }
  0x64   : > { %1881 = vsyncadd (%p2023_p5), %s322_s23, 4294966144  ;;  %p3068_p7 = scmp.eq.s32.totalorder %s2010_s8, 0 }
  0x66   : > { %1883 = dma.done.wait (%p3068_p7), [#allocation7], 12288   ;;  %p3069_p3 = pmov %p3068_p7 }
  0x67   : > { %s1501_s11 = smul.u32 24, %s2152_s19  ;;  %p3070_p8 = scmp.ne.s32.totalorder %s2010_s8, 0 }
  0x68   : > { %1885 = vsyncadd (%p3069_p3), [#allocation7], 4294955008  ;;  %s1502_s3 = smul.u32 24, %s323_s10 }
  0x69   : > { %s2177_s29 = scalar_lea.vmem [#allocation9], %s1501_s11  ;;  %381 = sbr.rel (%p3070_p8) target bundleno = 113 (0x71), region = 56 }
  0x6a   : > { %s2179_s21 = scalar_lea.vmem [#allocation10], %s1502_s3 }
  0x6e   : > { %v1929_v0 = vmov 0.0  }
  0x6f   : > { %382 = vst [vmem:[#allocation2] sm:$0xff] %v1929_v0 }
  0x70   : > { %383 = vst [vmem:[#allocation2 + $0x8] sm:$0xff] %v1929_v0 }
  0x71 PF: > { %v2183_v1 = vld [vmem:[#allocation8 + $0x168] sm:$0xff]  ;;  %v2185_v2 = vld [vmem:[#allocation8 + $0x150] sm:$0xff]  ;;  %v2193_v5 = vld [vmem:[#allocation8 + $0x138] sm:$0xff]  ;;  %s486_s9 = ssub.s32 2, %s2010_s8  ;;  %s2363_s27 = smul.u32 3, %s2010_s8 }
  0x72   : > { %3071 = vst [vmem:[#allocation28_spill] sm:$0xff] %v2183_v1  ;;  %v2187_v3 = vld [vmem:[#allocation8 + $0x2e8] sm:$0xff]  ;;  %510 = vmatpush.msra.mxu0 %v2183_v1  ;;  %v2191_v4 = vld [vmem:[#allocation8 + $0x2d0] sm:$0xff]  ;;  %v2195_v6 = vld [vmem:[#allocation8 + $0x2b8] sm:$0xff]  ;;  %s2379_s12 = smul.u32 3, %s486_s9  ;;  %p1486_p5 = scmp.ne.s32.totalorder %s2010_s8, 2 }
  0x73   : > { %3072 = vst [vmem:[#allocation29_spill] sm:$0xff] %v2185_v2  ;;  %630 = vmatpush.msra.mxu3 %v2187_v3  ;;  %v2197_v7 = vld [vmem:[#allocation8 + $0x170] sm:$0xff]  ;;  %v2201_v8 = vld [vmem:[#allocation8 + $0x158] sm:$0xff]  ;;  %v2203_v9 = vld [vmem:[#allocation8 + $0x120] sm:$0xff]  ;;  %s748_s17 = sadd.s32 1, %s2363_s27  ;;  %s994_s23 = sadd.s32 2, %s2363_s27 }
  0x74   : > { %3073 = vst [vmem:[#allocation30_spill] sm:$0xff] %v2193_v5  ;;  %511 = vmatpush.msra.mxu0 %v2185_v2  ;;  %530 = vmatpush.msra.mxu1 %v2197_v7  ;;  %v2206_v10 = vld [vmem:[#allocation8 + $0x2a0] sm:$0xff]  ;;  %v2212_v12 = vld [vmem:[#allocation8 + $0x108] sm:$0xff]  ;;  %v2221_v15 = vld [vmem:[#allocation8 + $0xf0] sm:$0xff]  ;;  %s493_s7 = sadd.s32 2, %s2379_s12  ;;  %s751_s10 = sadd.s32 1, %s2379_s12 }
  0x75   : > { %3074 = vst [vmem:[#allocation31_spill] sm:$0xff] %v2197_v7  ;;  %631 = vmatpush.msra.mxu3 %v2191_v4  ;;  %v2210_v11 = vld [vmem:[#allocation8 + $0x140] sm:$0xff]  ;;  %v2215_v13 = vld [vmem:[#allocation8 + $0x288] sm:$0xff]  ;;  %v2224_v16 = vld [vmem:[#allocation8 + $0x270] sm:$0xff] }
  0x76   : > { %3075 = vst [vmem:[#allocation32_spill] sm:$0xff] %v2201_v8  ;;  %512 = vmatpush.msra.mxu0 %v2193_v5  ;;  %531 = vmatpush.msra.mxu1 %v2201_v8  ;;  %v2219_v14 = vld [vmem:[#allocation8 + $0x128] sm:$0xff]  ;;  %v2228_v17 = vld [vmem:[#allocation8 + $0x110] sm:$0xff]  ;;  %v2230_v18 = vld [vmem:[#allocation8 + $0xd8] sm:$0xff] }
  0x77   : > { %3076 = vst [vmem:[#allocation33_spill] sm:$0xff] %v2203_v9  ;;  %632 = vmatpush.msra.mxu3 %v2195_v6  ;;  %v2233_v19 = vld [vmem:[#allocation8 + $0x258] sm:$0xff]  ;;  %v2241_v22 = vld [vmem:[#allocation8 + $0xc0] sm:$0xff]  ;;  %v2253_v26 = vld [vmem:[#allocation8 + $0x148] sm:$0xff] }
  0x78   : > { %3077 = vst [vmem:[#allocation34_spill] sm:$0xff] %v2210_v11  ;;  %513 = vmatpush.msra.mxu0 %v2203_v9  ;;  %532 = vmatpush.msra.mxu1 %v2210_v11  ;;  %v2237_v20 = vld [vmem:[#allocation8 + $0xf8] sm:$0xff]  ;;  %v2244_v23 = vld [vmem:[#allocation8 + $0x240] sm:$0xff]  ;;  %v2255_v27 = vld [vmem:[#allocation8 + $0xa8] sm:$0xff] }
  0x79   : > { %3078 = vst [vmem:[#allocation35_spill] sm:$0xff] %v2212_v12  ;;  %633 = vmatpush.msra.mxu3 %v2206_v10  ;;  %v2239_v21 = vld [vmem:[#allocation8 + $0x178] sm:$0xff]  ;;  %v2247_v24 = vld [vmem:[#allocation8 + $0x160] sm:$0xff]  ;;  %v2258_v28 = vld [vmem:[#allocation8 + $0x228] sm:$0xff] }
  0x7a   : > { %3079 = vst [vmem:[#allocation36_spill] sm:$0xff] %v2215_v13  ;;  %514 = vmatpush.msra.mxu0 %v2212_v12  ;;  %533 = vmatpush.msra.mxu1 %v2219_v14  ;;  %v2251_v25 = vld [vmem:[#allocation8 + $0xe0] sm:$0xff]  ;;  %v2263_v29 = vld [vmem:[#allocation8 + $0xc8] sm:$0xff]  ;;  %v2265_v30 = vld [vmem:[#allocation8 + $0x130] sm:$0xff] }
  0x7b   : > { %3080 = vst [vmem:[#allocation37_spill] sm:$0xff] %v2219_v14  ;;  %634 = vmatpush.msra.mxu3 %v2215_v13  ;;  %550 = vmatpush.msra.mxu2 %v2239_v21  ;;  %v2267_v31 = vld [vmem:[#allocation8 + $0x90] sm:$0xff]  ;;  %v2277_v34 = vld [vmem:[#allocation8 + $0x118] sm:$0xff]  ;;  %v2289_v38 = vld [vmem:[#allocation8 + $0x100] sm:$0xff] }
  0x7c   : > { %3081 = vst [vmem:[#allocation38_spill] sm:$0xff] %v2224_v16  ;;  %515 = vmatpush.msra.mxu0 %v2221_v15  ;;  %534 = vmatpush.msra.mxu1 %v2228_v17  ;;  %v2270_v32 = vld [vmem:[#allocation8 + $0x210] sm:$0xff]  ;;  %v2279_v35 = vld [vmem:[#allocation8 + $0x78] sm:$0xff]  ;;  %v2291_v39 = vld [vmem:[#allocation8 + $0x60] sm:$0xff] }
  0x7d   : > { %3082 = vst [vmem:[#allocation39_spill] sm:$0xff] %v2228_v17  ;;  %635 = vmatpush.msra.mxu3 %v2224_v16  ;;  %551 = vmatpush.msra.mxu2 %v2247_v24  ;;  %v2275_v33 = vld [vmem:[#allocation8 + $0xb0] sm:$0xff]  ;;  %v2282_v36 = vld [vmem:[#allocation8 + $0x1f8] sm:$0xff]  ;;  %v2294_v40 = vld [vmem:[#allocation8 + $0x1e0] sm:$0xff] }
  0x7e   : > { %3083 = vst [vmem:[#allocation40_spill] sm:$0xff] %v2230_v18  ;;  %516 = vmatpush.msra.mxu0 %v2230_v18  ;;  %535 = vmatpush.msra.mxu1 %v2237_v20  ;;  %v2287_v37 = vld [vmem:[#allocation8 + $0x98] sm:$0xff]  ;;  %v2299_v41 = vld [vmem:[#allocation8 + $0x80] sm:$0xff]  ;;  %v2301_v42 = vld [vmem:[#allocation8 + $0xe8] sm:$0xff] }
  0x7f   : > { %3084 = vst [vmem:[#allocation41_spill] sm:$0xff] %v2233_v19  ;;  %636 = vmatpush.msra.mxu3 %v2233_v19  ;;  %552 = vmatpush.msra.mxu2 %v2253_v26  ;;  %v2303_v43 = vld [vmem:[#allocation8 + $0x48] sm:$0xff]  ;;  %v2313_v46 = vld [vmem:[#allocation8 + $0xd0] sm:$0xff]  ;;  %v2325_v50 = vld [vmem:[#allocation8 + $0xb8] sm:$0xff]  ;;  %v494_v19 = vstv %s493_s7 }
  0x80   : > { %3085 = vst [vmem:[#allocation42_spill] sm:$0xff] %v2237_v20  ;;  %517 = vmatpush.msra.mxu0 %v2241_v22  ;;  %536 = vmatpush.msra.mxu1 %v2251_v25  ;;  %v2306_v44 = vld [vmem:[#allocation8 + $0x1c8] sm:$0xff]  ;;  %v2315_v47 = vld [vmem:[#allocation8 + $0x30] sm:$0xff]  ;;  %v2327_v51 = vld [vmem:[#allocation8 + $0x18] sm:$0xff] }
  0x81   : > { %3086 = vst [vmem:[#allocation43_spill] sm:$0xff] %v2244_v23  ;;  %637 = vmatpush.msra.mxu3 %v2244_v23  ;;  %553 = vmatpush.msra.mxu2 %v2265_v30  ;;  %v2311_v45 = vld [vmem:[#allocation8 + $0x68] sm:$0xff]  ;;  %v2318_v48 = vld [vmem:[#allocation8 + $0x1b0] sm:$0xff]  ;;  %v2330_v52 = vld [vmem:[#allocation8 + $0x198] sm:$0xff]  ;;  %v2983_v23 = vmov 0  }
  0x82   : > { %3087 = vst [vmem:[#allocation44_spill] sm:$0xff] %v2251_v25  ;;  %518 = vmatpush.msra.mxu0 %v2255_v27  ;;  %537 = vmatpush.msra.mxu1 %v2263_v29  ;;  %v2323_v49 = vld [vmem:[#allocation8 + $0x50] sm:$0xff]  ;;  %v2335_v53 = vld [vmem:[#allocation8 + $0x38] sm:$0xff]  ;;  %v2337_v54 = vld [vmem:[#allocation8 + $0xa0] sm:$0xff] }
  0x83   : > { %3088 = vst [vmem:[#allocation45_spill] sm:$0xff] %v2258_v28  ;;  %638 = vmatpush.msra.mxu3 %v2258_v28  ;;  %554 = vmatpush.msra.mxu2 %v2277_v34  ;;  %v2339_v55 = vld [vmem:[#allocation8] sm:$0xff]  ;;  %v2346_v57 = vld [vmem:[#allocation2] sm:$0xff]  ;;  %v2349_v58 = vld [vmem:[#allocation2 + $0x8] sm:$0xff] }
  0x84   : > { %3089 = vst [vmem:[#allocation46_spill] sm:$0xff] %v2270_v32  ;;  %519 = vmatpush.msra.mxu0 %v2267_v31  ;;  %538 = vmatpush.msra.mxu1 %v2275_v33  ;;  %v2342_v56 = vld [vmem:[#allocation8 + $0x180] sm:$0xff]  ;;  %v2351_v59 = vld [vmem:[#allocation8 + $0x2f0] sm:$0xff]  ;;  %v2360_v61 = vld [vmem:[#allocation8 + $0x88] sm:$0xff] }
  0x85   : > { %3090 = vst [vmem:[#allocation47_spill] sm:$0xff] %v2282_v36  ;;  %639 = vmatpush.msra.mxu3 %v2270_v32  ;;  %555 = vmatpush.msra.mxu2 %v2289_v38  ;;  %v2354_v60 = vld [vmem:[#allocation8 + $0x20] sm:$0xff]  ;;  %v2366_v62 = vld [vmem:[#allocation8 + $0x2d8] sm:$0xff]  ;;  %v2369_v63 = vld [vmem:[#allocation8 + $0x8] sm:$0xff] }
  0x86   : > { %3091 = vst [vmem:[#allocation48_spill] sm:$0xff] %v2289_v38  ;;  %520 = vmatpush.msra.mxu0 %v2279_v35  ;;  %539 = vmatpush.msra.mxu1 %v2287_v37  ;;  %v2373_v0 = vld [vmem:[#allocation8 + $0x2f8] sm:$0xff]  ;;  %v2397_v32 = vld [vmem:[#allocation8 + $0x2a8] sm:$0xff]  ;;  %v2406_v28 = vld [vmem:[#allocation8 + $0x40] sm:$0xff] }
  0x87   : > { %3092 = vst [vmem:[#allocation49_spill] sm:$0xff] %v2294_v40  ;;  %640 = vmatpush.msra.mxu3 %v2282_v36  ;;  %556 = vmatpush.msra.mxu2 %v2301_v42  ;;  %v491_v36 = vstv %s2363_s27 }
  0x88   : > { %3093 = vst [vmem:[#allocation50_spill] sm:$0xff] %v2301_v42  ;;  %521 = vmatpush.msra.mxu0 %v2291_v39  ;;  %540 = vmatpush.msra.mxu1 %v2299_v41 }
  0x89   : > { %3094 = vst [vmem:[#allocation51_spill] sm:$0xff] %v2306_v44  ;;  %641 = vmatpush.msra.mxu3 %v2294_v40  ;;  %557 = vmatpush.msra.mxu2 %v2313_v46  ;;  %v2394_v40 = vld [vmem:[%s2922_s2] sm:$0xff] }
  0x8a   : > { %3095 = vst [vmem:[#allocation52_spill] sm:$0xff] %v2313_v46  ;;  %522 = vmatpush.msra.mxu0 %v2303_v43  ;;  %541 = vmatpush.msra.mxu1 %v2311_v45  ;;  %vm492_vm0 = vcmp.lt.s32.totalorder %v491_v36, %v2394_v40  ;;  %v2415_v36 = vld [vmem:[#allocation8 + $0x2b0] sm:$0xff]  ;;  %vm495_vm1 = vcmp.lt.s32.totalorder %v494_v19, %v2394_v40 }
  0x8b   : > { %3096 = vst [vmem:[#allocation53_spill] sm:$0xff] %v2318_v48  ;;  %642 = vmatpush.msra.mxu3 %v2306_v44  ;;  %558 = vmatpush.msra.mxu2 %v2325_v50  ;;  %v2389_v44 = vld [vmem:[#allocation8 + $0x58] sm:$0xff] }
  0x8c   : > { %3097 = vst [vmem:[#allocation54_spill] sm:$0xff] %v2325_v50  ;;  %523 = vmatpush.msra.mxu0 %v2315_v47  ;;  %542 = vmatpush.msra.mxu1 %v2323_v49 }
  0x8d   : > { %3098 = vst [vmem:[#allocation55_spill] sm:$0xff] %v2330_v52  ;;  %643 = vmatpush.msra.mxu3 %v2318_v48  ;;  %559 = vmatpush.msra.mxu2 %v2337_v54  ;;  %v2387_v48 = vld [vmem:[#allocation8 + $0x2e0] sm:$0xff] }
  0x8e   : > { %3099 = vst [vmem:[#allocation56_spill] sm:$0xff] %v2337_v54  ;;  %524 = vmatpush.msra.mxu0 %v2327_v51  ;;  %543 = vmatpush.msra.mxu1 %v2335_v53  ;;  %v2420_v54 = vld [vmem:[#allocation8 + $0x278] sm:$0xff] }
  0x8f   : > { %3100 = vst [vmem:[#allocation57_spill] sm:$0xff] %v2342_v56  ;;  %644 = vmatpush.msra.mxu3 %v2330_v52  ;;  %v2381_v52 = vld [vmem:[#allocation8 + $0x2c0] sm:$0xff]  ;;  %560 = vmatpush.msra.mxu2 %v2360_v61 }
  0x90   : > { %3101 = vst [vmem:[#allocation58_spill] sm:$0xff] %v2346_v57  ;;  %525 = vmatpush.msra.mxu0 %v2339_v55  ;;  %544 = vmatpush.msra.mxu1 %v2354_v60 }
  0x91   : > { %3102 = vst [vmem:[#allocation59_spill] sm:$0xff] %v2349_v58  ;;  %645 = vmatpush.msra.mxu3 %v2342_v56  ;;  %526 = vmatmul.f32.vlgmr.msra.gmra.mxu0 %v2346_v57  ;;  %v2375_v56 = vld [vmem:[#allocation8 + $0x70] sm:$0xff] }
  0x92   : > { %3103 = vst [vmem:[#allocation60_spill] sm:$0xff] %v2360_v61  ;;  %646 = vmatmul.f32.vlgmr.msra.gmra.mxu3 %v2349_v58  ;;  %650 = vmatpush.msrb.mxu0 %v2351_v59  ;;  %v2409_v61 = vld [vmem:[#allocation8 + $0x290] sm:$0xff] }
  0x93   : > { %3104 = vst [vmem:[#allocation61_spill] sm:$0xff] %v2366_v62  ;;  %782 = vmatpush.msrb.mxu3 %v2197_v7  ;;  %545 = vmatpush.msra.mxu1 %v2369_v63  ;;  %v2404_v7 = vld [vmem:[#allocation8 + $0x2c8] sm:$0xff] }
  0x94   : > { %3105 = vst [vmem:[#allocation62_spill] sm:$0xff] %v2373_v0  ;;  %651 = vmatpush.msrb.mxu0 %v2366_v62  ;;  %561 = vmatpush.msra.mxu2 %v2375_v56  ;;  %v2427_v62 = vld [vmem:[#allocation8 + $0x10] sm:$0xff] }
  0x95   : > { %3106 = vst [vmem:[#allocation63_spill] sm:$0xff] %v2375_v56  ;;  %670 = vmatpush.msrb.mxu1 %v2373_v0  ;;  %v617_v56 = vsel %vm492_vm0, 1, %v2983_v23  ;;  %1609 = vset.pattern.permute.xlu0 %v2983_v23  ;;  %v2434_v23 = vld [vmem:[#allocation8 + $0x280] sm:$0xff] }
  0x96   : > { %3107 = vst [vmem:[#allocation64_spill] sm:$0xff] %v2381_v52  ;;  %652 = vmatpush.msrb.mxu0 %v2381_v52  ;;  %546 = vmatmul.f32.vlgmr.msra.gmra.mxu1 %v2346_v57  ;;  %v2417_v52 = vld [vmem:[#allocation8 + $0x28] sm:$0xff] }
  0x97   : > { %3108 = vst [vmem:[#allocation65_spill] sm:$0xff] %v2387_v48  ;;  %671 = vmatpush.msrb.mxu1 %v2387_v48  ;;  %562 = vmatpush.msra.mxu2 %v2389_v44 }
  0x98   : > { %3109 = vst [vmem:[#allocation66_spill] sm:$0xff] %v2389_v44  ;;  %653 = vmatpush.msrb.mxu0 %v2397_v32  ;;  %v2425_v44 = vld [vmem:[#allocation8 + $0x298] sm:$0xff]  ;;  %619 = vperm.xlu0 %1609, %v617_v56   ;;  %v2443_v56 = vld [vmem:[#allocation8 + $0x268] sm:$0xff] }
  0x99   : > { %3110 = vst [vmem:[#allocation67_spill] sm:$0xff] %v2394_v40  ;;  %672 = vmatpush.msrb.mxu1 %v2404_v7  ;;  %563 = vmatpush.msra.mxu2 %v2406_v28  ;;  %v2452_v40 = vld [vmem:[#allocation8 + $0x250] sm:$0xff] }
  0x9a   : > { %3111 = vst [vmem:[#allocation68_spill] sm:$0xff] %v2397_v32  ;;  %654 = vmatpush.msrb.mxu0 %v2409_v61  ;;  %v2429_v32 = vld [vmem:[#allocation8 + $0x260] sm:$0xff]  ;;  %783 = vmatpush.msrb.mxu3 %v2201_v8  ;;  %v2455_v8 = vld [vmem:[#allocation8 + $0x218] sm:$0xff] }
  0x9b   : > { %3112 = vst [vmem:[#allocation69_spill] sm:$0xff] %v2404_v7  ;;  %673 = vmatpush.msrb.mxu1 %v2415_v36  ;;  %564 = vmatpush.msra.mxu2 %v2417_v52 }
  0x9c   : > { %3113 = vst [vmem:[#allocation70_spill] sm:$0xff] %v2406_v28  ;;  %655 = vmatpush.msrb.mxu0 %v2420_v54  ;;  %v2438_v28 = vld [vmem:[#allocation8 + $0x248] sm:$0xff]  ;;  %784 = vmatpush.msrb.mxu3 %v2210_v11  ;;  %v2467_v11 = vld [vmem:[#allocation8 + $0x220] sm:$0xff] }
  0x9d   : > { %3114 = vst [vmem:[#allocation71_spill] sm:$0xff] %v2415_v36  ;;  %674 = vmatpush.msrb.mxu1 %v2425_v44  ;;  %565 = vmatpush.msra.mxu2 %v2427_v62 }
  0x9e   : > { %3115 = vst [vmem:[#allocation72_spill] sm:$0xff] %v2417_v52  ;;  %656 = vmatpush.msrb.mxu0 %v2429_v32  ;;  %566 = vmatmul.f32.vlgmr.msra.gmra.mxu2 %v2346_v57  ;;  %v2446_v52 = vld [vmem:[#allocation8 + $0x230] sm:$0xff]  ;;  %v2460_v57 = vld [vmem:[#allocation8 + $0x238] sm:$0xff] }
  0x9f   : > { %3116 = vst [vmem:[#allocation73_spill] sm:$0xff] %v2420_v54  ;;  %675 = vmatpush.msrb.mxu1 %v2434_v23  ;;  %v3121_v54 = vmov 0   ;;  %762 = vmatpush.msrb.mxu2 %v2183_v1  ;;  %v2470_v1 = vld [vmem:[#allocation8 + $0x1e8] sm:$0xff] }
  0xa0   : > { %3117 = vst [vmem:[#allocation74_spill] sm:$0xff] %v2425_v44  ;;  %v737_v19 = vsel %vm495_vm1, 1, %v3121_v54  ;;  %657 = vmatpush.msrb.mxu0 %v2438_v28  ;;  %v2462_v54 = vld [vmem:[#allocation8 + $0x200] sm:$0xff]  ;;  %785 = vmatpush.msrb.mxu3 %v2219_v14  ;;  %v2483_v14 = vld [vmem:[#allocation8 + $0x1f0] sm:$0xff] }
  0xa1   : > { %3118 = vst [vmem:[#allocation75_spill] sm:$0xff] %v2427_v62  ;;  %676 = vmatpush.msrb.mxu1 %v2443_v56  ;;  %763 = vmatpush.msrb.mxu2 %v2185_v2  ;;  %v2478_v2 = vld [vmem:[#allocation8 + $0x1d0] sm:$0xff] }
  0xa2   : > { %3119 = vst [vmem:[#allocation76_spill] sm:$0xff] %v2434_v23  ;;  %658 = vmatpush.msrb.mxu0 %v2446_v52  ;;  %739 = vperm.xlu0 %1609, %v737_v19   ;;  %v2475_v19 = vld [vmem:[#allocation8 + $0x208] sm:$0xff] }
  0xa3   : > { %3120 = vst [vmem:[#allocation77_spill] sm:$0xff] %v2443_v56  ;;  %677 = vmatpush.msrb.mxu1 %v2452_v40  ;;  %764 = vmatpush.msrb.mxu2 %v2193_v5  ;;  %v2486_v5 = vld [vmem:[#allocation8 + $0x1b8] sm:$0xff] }
  0xa4   : > { %3122 = vst [vmem:[#allocation78_spill] sm:$0xff] %v2452_v40  ;;  %659 = vmatpush.msrb.mxu0 %v2455_v8  ;;  %786 = vmatpush.msrb.mxu3 %v2228_v17  ;;  %v2491_v17 = vld [vmem:[#allocation8 + $0x1d8] sm:$0xff] }
  0xa5   : > { %3123 = vst [vmem:[#allocation79_spill] sm:$0xff] %v2460_v57  ;;  %678 = vmatpush.msrb.mxu1 %v2460_v57  ;;  %765 = vmatpush.msrb.mxu2 %v2203_v9  ;;  %v2494_v9 = vld [vmem:[#allocation8 + $0x1a0] sm:$0xff] }
  0xa6   : > { %3124 = vst [vmem:[#allocation80_spill] sm:$0xff] %v2467_v11  ;;  %660 = vmatpush.msrb.mxu0 %v2462_v54  ;;  %787 = vmatpush.msrb.mxu3 %v2237_v20  ;;  %v2499_v20 = vld [vmem:[#allocation8 + $0x1c0] sm:$0xff] }
  0xa7   : > { %3125 = vst [vmem:[#allocation81_spill] sm:$0xff] %v2475_v19  ;;  %679 = vmatpush.msrb.mxu1 %v2467_v11  ;;  %766 = vmatpush.msrb.mxu2 %v2212_v12  ;;  %v2502_v12 = vld [vmem:[#allocation8 + $0x188] sm:$0xff] }
  0xa8   : > { %661 = vmatpush.msrb.mxu0 %v2470_v1  ;;  %3126 = vst [vmem:[#allocation82_spill] sm:$0xff] %v2483_v14  ;;  %788 = vmatpush.msrb.mxu3 %v2251_v25  ;;  %v2507_v25 = vld [vmem:[#allocation8 + $0x1a8] sm:$0xff] }
  0xa9   : > { %680 = vmatpush.msrb.mxu1 %v2475_v19  ;;  %767 = vmatpush.msrb.mxu2 %v2221_v15  ;;  %3127 = vst [vmem:[#allocation83_spill] sm:$0xff] %v2499_v20 }
  0xaa   : > { %662 = vmatpush.msrb.mxu0 %v2478_v2  ;;  %789 = vmatpush.msrb.mxu3 %v2263_v29  ;;  %3128 = vst [vmem:[#allocation84_spill] sm:$0xff] %v2507_v25 }
  0xab   : > { %681 = vmatpush.msrb.mxu1 %v2483_v14  ;;  %768 = vmatpush.msrb.mxu2 %v2230_v18  ;;  %v2513_v18 = vld [vmem:[#allocation8 + $0x190] sm:$0xff] }
  0xac   : > { %663 = vmatpush.msrb.mxu0 %v2486_v5  ;;  %790 = vmatpush.msrb.mxu3 %v2275_v33  ;;  %3129 = vst [vmem:[#allocation85_spill] sm:$0xff] %v2513_v18 }
  0xad   : > { %682 = vmatpush.msrb.mxu1 %v2491_v17  ;;  %769 = vmatpush.msrb.mxu2 %v2241_v22 }
  0xae   : > { %664 = vmatpush.msrb.mxu0 %v2494_v9  ;;  %791 = vmatpush.msrb.mxu3 %v2287_v37 }
  0xaf   : > { %683 = vmatpush.msrb.mxu1 %v2499_v20  ;;  %770 = vmatpush.msrb.mxu2 %v2255_v27 }
  0xb0   : > { %665 = vmatpush.msrb.mxu0 %v2502_v12  ;;  %792 = vmatpush.msrb.mxu3 %v2299_v41 }
  0xb1   : > { %666 = vmatmul.f32.vlgmr.msrb.gmra.mxu0 %v2349_v58  ;;  %684 = vmatpush.msrb.mxu1 %v2507_v25 }
  0xb2   : > { %802 = vmatpush.msra.mxu0 %v2239_v21  ;;  %771 = vmatpush.msrb.mxu2 %v2267_v31 }
  0xb3   : > { %685 = vmatpush.msrb.mxu1 %v2513_v18  ;;  %793 = vmatpush.msrb.mxu3 %v2311_v45 }
  0xb4   : > { %686 = vmatmul.f32.vlgmr.msrb.gmra.mxu1 %v2349_v58  ;;  %803 = vmatpush.msra.mxu0 %v2247_v24  ;;  %v3130_v58 = vld [vmem:[#allocation61_spill] sm:$0xff] }
  0xb5   : > { %772 = vmatpush.msrb.mxu2 %v2279_v35  ;;  %875 = vmatpush.msra.mxu1 %v2187_v3 }
  0xb6   : > { %804 = vmatpush.msra.mxu0 %v2253_v26  ;;  %794 = vmatpush.msrb.mxu3 %v2323_v49 }
  0xb7   : > { %773 = vmatpush.msrb.mxu2 %v2291_v39  ;;  %876 = vmatpush.msra.mxu1 %v2191_v4 }
  0xb8   : > { %805 = vmatpush.msra.mxu0 %v2265_v30  ;;  %795 = vmatpush.msrb.mxu3 %v2335_v53 }
  0xb9   : > { %774 = vmatpush.msrb.mxu2 %v2303_v43  ;;  %877 = vmatpush.msra.mxu1 %v2195_v6 }
  0xba   : > { %806 = vmatpush.msra.mxu0 %v2277_v34  ;;  %796 = vmatpush.msrb.mxu3 %v2354_v60 }
  0xbb   : > { %775 = vmatpush.msrb.mxu2 %v2315_v47  ;;  %878 = vmatpush.msra.mxu1 %v2206_v10 }
  0xbc   : > { %807 = vmatpush.msra.mxu0 %v2289_v38  ;;  %797 = vmatpush.msrb.mxu3 %v2369_v63  ;;  %v3133_v38 = vld [vmem:[#allocation64_spill] sm:$0xff] }
  0xbd   : > { %776 = vmatpush.msrb.mxu2 %v2327_v51  ;;  %879 = vmatpush.msra.mxu1 %v2215_v13  ;;  %v3135_v13 = vld [vmem:[#allocation60_spill] sm:$0xff] }
  0xbe   : > { %808 = vmatpush.msra.mxu0 %v2301_v42  ;;  %915 = vmatpush.msra.mxu3 %v2373_v0  ;;  %v3131_v42 = vld [vmem:[#allocation41_spill] sm:$0xff]  ;;  %v3132_v0 = vld [vmem:[#allocation56_spill] sm:$0xff] }
  0xbf   : > { %777 = vmatpush.msrb.mxu2 %v2339_v55  ;;  %880 = vmatpush.msra.mxu1 %v2224_v16  ;;  %v3138_v16 = vld [vmem:[#allocation63_spill] sm:$0xff] }
  0xc0   : > { %809 = vmatpush.msra.mxu0 %v2313_v46  ;;  %916 = vmatpush.msra.mxu3 %v2387_v48  ;;  %v3134_v46 = vld [vmem:[#allocation43_spill] sm:$0xff]  ;;  %v3136_v48 = vld [vmem:[#allocation68_spill] sm:$0xff] }
  0xc1   : > { %895 = vmatpush.msra.mxu2 %v2351_v59  ;;  %881 = vmatpush.msra.mxu1 %v3131_v42 }
  0xc2   : > { %810 = vmatpush.msra.mxu0 %v2325_v50  ;;  %917 = vmatpush.msra.mxu3 %v2404_v7  ;;  %v3137_v50 = vld [vmem:[#allocation45_spill] sm:$0xff]  ;;  %v3139_v7 = vld [vmem:[#allocation46_spill] sm:$0xff] }
  0xc3   : > { %896 = vmatpush.msra.mxu2 %v3130_v58  ;;  %882 = vmatpush.msra.mxu1 %v3134_v46  ;;  %v3143_v46 = vld [vmem:[#allocation70_spill] sm:$0xff] }
  0xc4   : > { %811 = vmatpush.msra.mxu0 %v3132_v0  ;;  %918 = vmatpush.msra.mxu3 %v2415_v36  ;;  %v3140_v0 = vld [vmem:[#allocation66_spill] sm:$0xff]  ;;  %v3141_v36 = vld [vmem:[#allocation73_spill] sm:$0xff] }
  0xc5   : > { %897 = vmatpush.msra.mxu2 %v3133_v38  ;;  %883 = vmatpush.msra.mxu1 %v3137_v50 }
  0xc6   : > { %812 = vmatpush.msra.mxu0 %v3135_v13  ;;  %919 = vmatpush.msra.mxu3 %v2425_v44  ;;  %v3142_v13 = vld [vmem:[#allocation47_spill] sm:$0xff]  ;;  %v3144_v44 = vld [vmem:[#allocation49_spill] sm:$0xff] }
  0xc7   : > { %898 = vmatpush.msra.mxu2 %v3136_v48  ;;  %884 = vmatpush.msra.mxu1 %v3139_v7 }
  0xc8   : > { %813 = vmatpush.msra.mxu0 %v3138_v16  ;;  %920 = vmatpush.msra.mxu3 %v2434_v23  ;;  %v3145_v16 = vld [vmem:[#allocation72_spill] sm:$0xff]  ;;  %v3146_v23 = vld [vmem:[#allocation51_spill] sm:$0xff] }
  0xc9   : > { %899 = vmatpush.msra.mxu2 %v2409_v61  ;;  %885 = vmatpush.msra.mxu1 %v3142_v13 }
  0xca   : > { %814 = vmatpush.msra.mxu0 %v3140_v0  ;;  %921 = vmatpush.msra.mxu3 %v2443_v56  ;;  %v3147_v56 = vld [vmem:[#allocation53_spill] sm:$0xff] }
  0xcb   : > { %900 = vmatpush.msra.mxu2 %v3141_v36  ;;  %886 = vmatpush.msra.mxu1 %v3144_v44 }
  0xcc   : > { %815 = vmatpush.msra.mxu0 %v3143_v46  ;;  %922 = vmatpush.msra.mxu3 %v2452_v40  ;;  %v3148_v40 = vmov 0  }
  0xcd   : > { %901 = vmatpush.msra.mxu2 %v2429_v32  ;;  %887 = vmatpush.msra.mxu1 %v3146_v23 }
  0xce   : > { %816 = vmatpush.msra.mxu0 %v3145_v16  ;;  %923 = vmatpush.msra.mxu3 %v2460_v57  ;;  %v3149_v16 = vld [vmem:[#allocation55_spill] sm:$0xff]  ;;  %v3150_v57 = vld [vmem:[#allocation28_spill] sm:$0xff] }
  0xcf   : > { %902 = vmatpush.msra.mxu2 %v2438_v28  ;;  %888 = vmatpush.msra.mxu1 %v3147_v56  ;;  %v3153_v56 = vld [vmem:[#allocation29_spill] sm:$0xff] }
  0xd0   : > { %817 = vmatpush.msra.mxu0 %v2427_v62  ;;  %924 = vmatpush.msra.mxu3 %v2467_v11  ;;  %v3151_v62 = vld [vmem:[#allocation57_spill] sm:$0xff]  ;;  %v3152_v11 = vld [vmem:[#allocation31_spill] sm:$0xff] }
  0xd1   : > { %903 = vmatpush.msra.mxu2 %v2446_v52  ;;  %1610 = vset.pattern.permute.xlu1 %v3148_v40 }
  0xd2   : > { %925 = vmatpush.msra.mxu3 %v2475_v19  ;;  %889 = vmatpush.msra.mxu1 %v3149_v16  ;;  %v3154_v19 = vld [vmem:[#allocation32_spill] sm:$0xff]  ;;  %v3155_v16 = vld [vmem:[#allocation30_spill] sm:$0xff] }
  0xd3   : > { %904 = vmatpush.msra.mxu2 %v2455_v8  ;;  %1006 = vmatpush.msrb.mxu0 %v3150_v57  ;;  %v3156_v57 = vld [vmem:[#allocation34_spill] sm:$0xff] }
  0xd4   : > { %926 = vmatpush.msra.mxu3 %v2483_v14  ;;  %890 = vmatpush.msra.mxu1 %v3151_v62  ;;  %v3157_v14 = vld [vmem:[#allocation33_spill] sm:$0xff] }
  0xd5   : > { %905 = vmatpush.msra.mxu2 %v2462_v54  ;;  %1007 = vmatpush.msrb.mxu0 %v3153_v56  ;;  %v3159_v56 = vld [vmem:[#allocation35_spill] sm:$0xff] }
  0xd6   : > { %1026 = vmatpush.msrb.mxu1 %v3152_v11  ;;  %927 = vmatpush.msra.mxu3 %v2491_v17  ;;  %v3158_v11 = vld [vmem:[#allocation37_spill] sm:$0xff] }
  0xd7   : > { %906 = vmatpush.msra.mxu2 %v2470_v1  ;;  %1008 = vmatpush.msrb.mxu0 %v3155_v16  ;;  %v3161_v16 = vld [vmem:[#allocation42_spill] sm:$0xff] }
  0xd8   : > { %1027 = vmatpush.msrb.mxu1 %v3154_v19  ;;  %928 = vmatpush.msra.mxu3 %v2499_v20  ;;  %v3160_v19 = vld [vmem:[#allocation39_spill] sm:$0xff] }
  0xd9   : > { %907 = vmatpush.msra.mxu2 %v2478_v2  ;;  %1009 = vmatpush.msrb.mxu0 %v3157_v14  ;;  %v3163_v14 = vld [vmem:[#allocation44_spill] sm:$0xff] }
  0xda   : > { %1028 = vmatpush.msrb.mxu1 %v3156_v57  ;;  %929 = vmatpush.msra.mxu3 %v2507_v25  ;;  %v3162_v57 = vld [vmem:[#allocation40_spill] sm:$0xff] }
  0xdb   : > { %908 = vmatpush.msra.mxu2 %v2486_v5  ;;  %1010 = vmatpush.msrb.mxu0 %v3159_v56 }
  0xdc   : > { %1029 = vmatpush.msrb.mxu1 %v3158_v11  ;;  %930 = vmatpush.msra.mxu3 %v2513_v18 }
  0xdd   : > { %909 = vmatpush.msra.mxu2 %v2494_v9  ;;  %1011 = vmatpush.msrb.mxu0 %v2221_v15  ;;  %v481_v15 = vld [vmem:[%s2924_s4] sm:$0x7] }
  0xde   : > { %1030 = vmatpush.msrb.mxu1 %v3160_v19  ;;  %1611 = vset.pattern.permute.xlu2 %v3148_v40 }
  0xdf   : > { %910 = vmatpush.msra.mxu2 %v2502_v12  ;;  %1012 = vmatpush.msrb.mxu0 %v3162_v57 }
  0xe0   : > { %1031 = vmatpush.msrb.mxu1 %v3161_v16 }
  0xe1   : > { %1013 = vmatpush.msrb.mxu0 %v2241_v22  ;;  %v2634_v22 = vperm.slane %v481_v15, 0 }
  0xe2   : > { %1032 = vmatpush.msrb.mxu1 %v3163_v14 }
  0xe3   : > { %1014 = vmatpush.msrb.mxu0 %v2255_v27  ;;  %3164 = vst [vmem:[#allocation61_spill] sm:$0xff] %v2634_v22  ;;  %v496_v27 = vld [vmem:[%s2156_s18] sm:$0xff] }
  0xe4   : > { %1033 = vmatpush.msrb.mxu1 %v2263_v29 }
  0xe5   : > { %1015 = vmatpush.msrb.mxu0 %v2267_v31  ;;  %v2640_v31 = vld [vmem:[%s2924_s4 + $0x3] sm:$0x7] }
  0xe6   : > { %1034 = vmatpush.msrb.mxu1 %v2275_v33 }
  0xe7   : > { %1016 = vmatpush.msrb.mxu0 %v2279_v35  ;;  %v2643_v35 = vperm.slane %v481_v15, 1 }
  0xe8   : > { %1035 = vmatpush.msrb.mxu1 %v2287_v37 }
  0xe9   : > { %1017 = vmatpush.msrb.mxu0 %v2291_v39  ;;  %3165 = vst [vmem:[#allocation41_spill] sm:$0xff] %v2643_v35  ;;  %v2646_v39 = vperm.slane %v2640_v31, 0 }
  0xea   : > { %1036 = vmatpush.msrb.mxu1 %v2299_v41 }
  0xeb   : > { %1018 = vmatpush.msrb.mxu0 %v2303_v43  ;;  %3166 = vst [vmem:[#allocation64_spill] sm:$0xff] %v2646_v39  ;;  %v497_v43 = vld [vmem:[%s2156_s18 + $0x8] sm:$0xff] }
  0xec   : > { %1037 = vmatpush.msrb.mxu1 %v2311_v45 }
  0xed   : > { %1019 = vmatpush.msrb.mxu0 %v2315_v47 }
  0xee   : > { %1038 = vmatpush.msrb.mxu1 %v2323_v49  ;;  %v1458_v49 = vld [vmem:[%s2166_s20 + $0x30] sm:$0xff] }
  0xef   : > { %1020 = vmatpush.msrb.mxu0 %v2327_v51 }
  0xf0   : > { %1039 = vmatpush.msrb.mxu1 %v2335_v53 }
  0xf1   : > { %1021 = vmatpush.msrb.mxu0 %v2339_v55 }
  0xf2   : > { %1040 = vmatpush.msrb.mxu1 %v2354_v60 }
  0xf4   : > { %1041 = vmatpush.msrb.mxu1 %v2369_v63 }
 0x10e   : > { %v527_v29 = vpop.f32.mrf.mxu0 }
 0x10f   : > { %v528_v33 = vadd.f32 %v527_v29, %v2634_v22 }
 0x111   : > { %v570_v37 = vadd.f32 %v528_v33, %v496_v27 }
 0x113   : > { %v1461_v41 = vmul.f32 -1.442695, %v570_v37  ;;  %v547_v45 = vpop.f32.mrf.mxu1 }
 0x114   : > { %v548_v47 = vadd.f32 %v547_v45, %v2643_v35 }
 0x115   : > { %v647_v51 = vpop.f32.mrf.mxu3  ;;  %1612 = vpow2.f32 %v1461_v41 }
 0x116   : > { %v648_v53 = vadd.f32 %v647_v51, %v2646_v39  ;;  %v590_v55 = vadd.f32 %v548_v47, %v497_v43  ;;  %v2655_v43 = vperm.slane %v481_v15, 2  ;;  %v1459_v39 = vld [vmem:[%s2166_s20 + $0x38] sm:$0xff] }
 0x118   : > { %v690_v60 = vadd.f32 %v1458_v49, %v648_v53  ;;  %v1462_v63 = vmul.f32 -1.442695, %v590_v55  ;;  %3167 = vst [vmem:[#allocation68_spill] sm:$0xff] %v2655_v43 }
 0x11a   : > { %v1463_v11 = vmul.f32 -1.442695, %v690_v60  ;;  %1614 = vpow2.f32 %v1462_v63  ;;  %v2664_v63 = vperm.slane %v2640_v31, 1 }
 0x11b   : > { %v1613_v56 = vpop.eup %1612 }
 0x11c   : > { %1616 = vpow2.f32 %v1463_v11  ;;  %v574_v19 = vadd.f32 1.0, %v1613_v56 }
 0x11e   : > { %1618 = vrcp.f32 %v574_v19  ;;  %v584_v37 = vand.u32 2147483647, %v574_v19  ;;  %v586_v41 = vand.u32 2147483648, %v574_v19  ;;  %vm580_vm2 = vweird.f32 %v574_v19 }
 0x120   : > { %v1615_v16 = vpop.eup %1614  ;;  %vm585_vm5 = vcmp.eq.f32.partialorder %v584_v37, 8.507059e+37  ;;  %v587_v60 = vor.u32 1.1754944e-38, %v586_v41  ;;  %v498_v37 = vld [vmem:[%s2156_s18 + $0x10] sm:$0xff] }
 0x121   : > { %v594_v14 = vadd.f32 1.0, %v1615_v16  ;;  %v567_v47 = vpop.f32.mrf.mxu2 }
 0x122   : > { %v1617_v57 = vpop.eup %1616  ;;  %v568_v11 = vadd.f32 %v567_v47, %v2655_v43 }
 0x123   : > { %v2652_v27 = vadd.f32 1.0, %v1617_v57  ;;  %1620 = vrcp.f32 %v594_v14  ;;  %vm600_vm6 = vweird.f32 %v594_v14 }
 0x124   : > { %v1619_v29 = vpop.eup %1618 }
 0x125   : > { %1622 = vrcp.f32 %v2652_v27  ;;  %v576_v33 = vmul.f32 %v1619_v29, %v574_v19  ;;  %vm581_vm3 = vweird.f32 %v1619_v29  ;;  %v606_v19 = vand.u32 2147483648, %v594_v14 }
 0x126   : > { %vm2659_vm4 = vmor %vm580_vm2, %vm581_vm3  ;;  %vm700_vm10 = vweird.f32 %v2652_v27 }
 0x127   : > { %v577_v45 = vsub.f32 1.0, %v576_v33  ;;  %v604_v33 = vand.u32 2147483647, %v594_v14 }
 0x129   : > { %v1621_v49 = vpop.eup %1620  ;;  %v578_v51 = vmul.f32 %v1619_v29, %v577_v45  ;;  %vm605_vm9 = vcmp.eq.f32.partialorder %v604_v33, 8.507059e+37  ;;  %v2690_v33 = vperm.slane %v2640_v31, 2 }
 0x12a   : > { %v596_v15 = vmul.f32 %v1621_v49, %v594_v14  ;;  %vm601_vm7 = vweird.f32 %v1621_v49 }
 0x12b   : > { %v2657_v53 = vpop.eup %1622  ;;  %v579_v56 = vadd.f32 %v1619_v29, %v578_v51  ;;  %vm602_vm8 = vmor %vm600_vm6, %vm601_vm7  ;;  %v607_v51 = vor.u32 1.1754944e-38, %v606_v19 }
 0x12c   : > { %v696_v16 = vmul.f32 %v2657_v53, %v2652_v27  ;;  %v597_v57 = vsub.f32 1.0, %v596_v15  ;;  %vm701_vm11 = vweird.f32 %v2657_v53 }
 0x12d   : > { %v583_v45 = vsel %vm2659_vm4, %v1619_v29, %v579_v56  ;;  %v3171_v56 = vld [vmem:[#allocation67_spill] sm:$0xff]  ;;  %vm2684_vm13 = vmor %vm700_vm10, %vm701_vm11 }
 0x12e   : > { %v588_v41 = vsel %vm585_vm5, %v587_v60, %v583_v45  ;;  %v667_v35 = vpop.f32.mrf.mxu0  ;;  %v598_v22 = vmul.f32 %v1621_v49, %v597_v57  ;;  %v697_v43 = vsub.f32 1.0, %v696_v16  ;;  %v749_v57 = vstv %s748_s17 }
 0x12f   : > { %v610_v18 = vmul.f32 %v588_v41, %v568_v11  ;;  %v668_v47 = vadd.f32 %v667_v35, %v2664_v63  ;;  %v704_v11 = vand.u32 2147483647, %v2652_v27  ;;  %vm750_vm0 = vcmp.lt.s32.totalorder %v749_v57, %v3171_v56 }
 0x130   : > { %v599_v25 = vadd.f32 %v1621_v49, %v598_v22  ;;  %v698_v60 = vmul.f32 %v2657_v53, %v697_v43  ;;  %v706_v22 = vand.u32 2147483648, %v2652_v27 }
 0x131   : > { %v611_v15 = vadd.f32 %v610_v18, %v498_v37  ;;  %v710_v14 = vadd.f32 %v1459_v39, %v668_v47  ;;  %v752_v18 = vstv %s751_s10  ;;  %v620_v39 = vpop.permute.xlu0 %619  ;;  %v687_v37 = vpop.f32.mrf.mxu1  ;;  %vm705_vm14 = vcmp.eq.f32.partialorder %v704_v11, 8.507059e+37 }
 0x132   : > { %v603_v20 = vsel %vm602_vm8, %v1621_v49, %v599_v25  ;;  %v699_v25 = vadd.f32 %v2657_v53, %v698_v60  ;;  %v3170_v49 = vld [vmem:[#allocation58_spill] sm:$0xff]  ;;  %vm753_vm12 = vcmp.lt.s32.totalorder %v752_v18, %v3171_v56  ;;  %v707_v41 = vor.u32 1.1754944e-38, %v706_v22 }
 0x133   : > { %1624 = vtanh.f32 %v611_v15  ;;  %v1464_v29 = vmul.f32 -1.442695, %v710_v14  ;;  %v608_v55 = vsel %vm605_vm9, %v607_v51, %v603_v20  ;;  %v982_v16 = vsel %vm753_vm12, 1, %v3148_v40 }
 0x134   : > { %v613_v35 = vsub.f32 1.0, %v608_v55  ;;  %v615_v20 = vmul.f32 %v608_v55, %v3170_v49  ;;  %984 = vperm.xlu1 %1610, %v982_v16   ;;  %vm621_vm15 = vcmp.eq.s32.totalorder %v620_v39, 1  ;;  %v703_v51 = vsel %vm2684_vm13, %v2657_v53, %v699_v25  ;;  %v3179_v25 = vld [vmem:[#allocation43_spill] sm:$0xff] }
 0x135   : > { %1626 = vpow2.f32 %v1464_v29  ;;  %v688_v31 = vadd.f32 %v687_v37, %v2690_v33  ;;  %v708_v55 = vsel %vm705_vm14, %v707_v41, %v703_v51  ;;  %v869_v60 = vsel %vm750_vm0, 1, %v3148_v40  ;;  %v3199_v37 = vld [vmem:[#allocation81_spill] sm:$0xff]  ;;  %v3201_v41 = vld [vmem:[#allocation83_spill] sm:$0xff] }
 0x137   : > { %v730_v53 = vmul.f32 %v708_v55, %v688_v31 }
 0x139   : > { %v1625_v43 = vpop.eup %1624 }
 0x13a   : > { %v614_v27 = vmul.f32 %v1625_v43, %v613_v35  ;;  %v1460_v35 = vld [vmem:[%s2166_s20 + $0x40] sm:$0xff]  ;;  %v3181_v43 = vld [vmem:[#allocation59_spill] sm:$0xff] }
 0x13b   : > { %v1627_v45 = vpop.eup %1626 }
 0x13c   : > { %v714_v47 = vadd.f32 1.0, %v1627_v45  ;;  %v616_v15 = vadd.f32 %v615_v20, %v614_v27  ;;  %871 = vperm.xlu1 %1610, %v869_v60   ;;  %v3191_v27 = vld [vmem:[#allocation55_spill] sm:$0xff]  ;;  %v3198_v45 = vld [vmem:[#allocation80_spill] sm:$0xff]  ;;  %v3205_v60 = vld [vmem:[#allocation41_spill] sm:$0xff] }
 0x13e   : > { %1628 = vrcp.f32 %v714_v47  ;;  %v2698_v14 = vsel %vm621_vm15, %v616_v15, %v3170_v49  ;;  %v743_v29 = vsel %vm621_vm15, %v616_v15, 0.0  ;;  %vm720_vm2 = vweird.f32 %v714_v47  ;;  %v740_v49 = vpop.permute.xlu0 %739  ;;  %v1467_v15 = vld [vmem:[%s2156_s18 + $0x20] sm:$0xff] }
 0x13f   : > { %744 = vst [vmem:[%s2177_s29] sm:$0xff] %v743_v29  ;;  %778 = vmatmul.f32.vlgmr.msrb.gmra.mxu2 %v2698_v14  ;;  %798 = vmatmul.f32.vlgmr.msrb.gmra.mxu3 %v2698_v14  ;;  %vm741_vm5 = vcmp.eq.s32.totalorder %v740_v49, 1  ;;  %v3204_v29 = vld [vmem:[#allocation61_spill] sm:$0xff] }
 0x140   : > { %818 = vmatmul.f32.vlgmr.msra.gmra.mxu0 %v2698_v14  ;;  %1046 = vmatpush.msrb.mxu2 %v2239_v21 }
 0x141   : > { %1119 = vmatpush.msrb.mxu3 %v2187_v3  ;;  %1139 = vmatpush.msra.mxu0 %v2351_v59  ;;  %v731_v3 = vadd.f32 %v1460_v35, %v730_v53 }
 0x142   : > { %1047 = vmatpush.msrb.mxu2 %v2247_v24  ;;  %v726_v24 = vand.u32 2147483648, %v714_v47 }
 0x143   : > { %1120 = vmatpush.msrb.mxu3 %v2191_v4  ;;  %1140 = vmatpush.msra.mxu0 %v3130_v58  ;;  %v724_v58 = vand.u32 2147483647, %v714_v47  ;;  %1630 = vtanh.f32 %v731_v3 }
 0x144   : > { %v1629_v11 = vpop.eup %1628  ;;  %1048 = vmatpush.msrb.mxu2 %v2253_v26  ;;  %v3174_v26 = vld [vmem:[#allocation36_spill] sm:$0xff] }
 0x145   : > { %v716_v22 = vmul.f32 %v1629_v11, %v714_v47  ;;  %1121 = vmatpush.msrb.mxu3 %v2195_v6  ;;  %1141 = vmatpush.msra.mxu0 %v3133_v38  ;;  %vm721_vm1 = vweird.f32 %v1629_v11  ;;  %v3175_v6 = vld [vmem:[#allocation48_spill] sm:$0xff]  ;;  %vm725_vm4 = vcmp.eq.f32.partialorder %v724_v58, 8.507059e+37  ;;  %v3203_v47 = vld [vmem:[#allocation85_spill] sm:$0xff] }
 0x146   : > { %1049 = vmatpush.msrb.mxu2 %v2265_v30  ;;  %v3176_v30 = vld [vmem:[#allocation38_spill] sm:$0xff]  ;;  %vm722_vm3 = vmor %vm720_vm2, %vm721_vm1  ;;  %v1469_v58 = vld [vmem:[%s2166_s20 + $0x18] sm:$0xff] }
 0x147   : > { %v717_v21 = vsub.f32 1.0, %v716_v22  ;;  %1122 = vmatpush.msrb.mxu3 %v2206_v10  ;;  %1142 = vmatpush.msra.mxu0 %v3136_v48  ;;  %v727_v10 = vor.u32 1.1754944e-38, %v726_v24  ;;  %v3177_v48 = vld [vmem:[#allocation50_spill] sm:$0xff] }
 0x148   : > { %1050 = vmatpush.msrb.mxu2 %v2277_v34 }
 0x149   : > { %v718_v4 = vmul.f32 %v1629_v11, %v717_v21  ;;  %1123 = vmatpush.msrb.mxu3 %v3174_v26  ;;  %1143 = vmatpush.msra.mxu0 %v2409_v61  ;;  %v3178_v61 = vld [vmem:[#allocation52_spill] sm:$0xff]  ;;  %v1631_v39 = vpop.eup %1630 }
 0x14a   : > { %1051 = vmatpush.msrb.mxu2 %v3175_v6  ;;  %v3206_v6 = vld [vmem:[#allocation64_spill] sm:$0xff] }
 0x14b   : > { %v719_v38 = vadd.f32 %v1629_v11, %v718_v4  ;;  %1124 = vmatpush.msrb.mxu3 %v3176_v30  ;;  %1144 = vmatpush.msra.mxu0 %v3141_v36  ;;  %v3180_v36 = vld [vmem:[#allocation54_spill] sm:$0xff] }
 0x14c   : > { %1052 = vmatpush.msrb.mxu2 %v3177_v48 }
 0x14d   : > { %v723_v34 = vsel %vm722_vm3, %v1629_v11, %v719_v38  ;;  %1125 = vmatpush.msrb.mxu3 %v3131_v42  ;;  %1145 = vmatpush.msra.mxu0 %v2429_v32  ;;  %v3182_v32 = vld [vmem:[#allocation56_spill] sm:$0xff] }
 0x14e   : > { %v728_v59 = vsel %vm725_vm4, %v727_v10, %v723_v34  ;;  %1053 = vmatpush.msrb.mxu2 %v3178_v61  ;;  %v1470_v61 = vld [vmem:[%s2166_s20 + $0x20] sm:$0xff] }
 0x14f   : > { %v733_v18 = vsub.f32 1.0, %v728_v59  ;;  %1126 = vmatpush.msrb.mxu3 %v3179_v25  ;;  %1146 = vmatpush.msra.mxu0 %v2438_v28  ;;  %v735_v19 = vmul.f32 %v728_v59, %v3181_v43  ;;  %v3183_v28 = vld [vmem:[#allocation60_spill] sm:$0xff] }
 0x150   : > { %1054 = vmatpush.msrb.mxu2 %v3180_v36 }
 0x151   : > { %v734_v20 = vmul.f32 %v1631_v39, %v733_v18  ;;  %1127 = vmatpush.msrb.mxu3 %v3137_v50  ;;  %1147 = vmatpush.msra.mxu0 %v2446_v52  ;;  %v3186_v50 = vld [vmem:[#allocation65_spill] sm:$0xff] }
 0x152   : > { %1055 = vmatpush.msrb.mxu2 %v3182_v32  ;;  %v3188_v52 = vld [vmem:[#allocation53_spill] sm:$0xff] }
 0x153   : > { %v736_v42 = vadd.f32 %v735_v19, %v734_v20  ;;  %1128 = vmatpush.msrb.mxu3 %v3139_v7  ;;  %1148 = vmatpush.msra.mxu0 %v2455_v8  ;;  %v3184_v7 = vld [vmem:[#allocation62_spill] sm:$0xff]  ;;  %v3185_v8 = vld [vmem:[#allocation63_spill] sm:$0xff] }
 0x154   : > { %1056 = vmatpush.msrb.mxu2 %v3183_v28 }
 0x155   : > { %v2739_v16 = vsel %vm741_vm5, %v736_v42, %v3181_v43  ;;  %v745_v57 = vsel %vm741_vm5, %v736_v42, 0.0  ;;  %1129 = vmatpush.msrb.mxu3 %v3142_v13  ;;  %1149 = vmatpush.msra.mxu0 %v2462_v54  ;;  %v3187_v13 = vld [vmem:[#allocation69_spill] sm:$0xff]  ;;  %v3189_v54 = vld [vmem:[#allocation71_spill] sm:$0xff] }
 0x156   : > { %1465 = vst [vmem:[%s2179_s21 + $0x10] sm:$0xff] %v745_v57  ;;  %891 = vmatmul.f32.vlgmr.msra.gmra.mxu1 %v2739_v16  ;;  %911 = vmatmul.f32.vlgmr.msra.gmra.mxu2 %v2739_v16 }
 0x157   : > { %931 = vmatmul.f32.vlgmr.msra.gmra.mxu3 %v2739_v16  ;;  %1159 = vmatpush.msra.mxu1 %v3184_v7 }
 0x158   : > { %1057 = vmatpush.msrb.mxu2 %v3185_v8  ;;  %1130 = vmatpush.msrb.mxu3 %v3144_v44  ;;  %v3190_v44 = vld [vmem:[#allocation72_spill] sm:$0xff] }
 0x159   : > { %1160 = vmatpush.msra.mxu1 %v3186_v50  ;;  %1150 = vmatpush.msra.mxu0 %v2470_v1  ;;  %v3192_v1 = vld [vmem:[#allocation74_spill] sm:$0xff] }
 0x15a   : > { %1058 = vmatpush.msrb.mxu2 %v3140_v0  ;;  %1131 = vmatpush.msrb.mxu3 %v3146_v23  ;;  %v3193_v23 = vld [vmem:[#allocation75_spill] sm:$0xff] }
 0x15b   : > { %1161 = vmatpush.msra.mxu1 %v3187_v13  ;;  %1151 = vmatpush.msra.mxu0 %v2478_v2  ;;  %v3194_v2 = vld [vmem:[#allocation76_spill] sm:$0xff]  ;;  %v3197_v0 = vld [vmem:[#allocation79_spill] sm:$0xff] }
 0x15c   : > { %1059 = vmatpush.msrb.mxu2 %v3143_v46  ;;  %1132 = vmatpush.msrb.mxu3 %v3188_v52  ;;  %v3195_v46 = vld [vmem:[#allocation77_spill] sm:$0xff] }
 0x15d   : > { %1162 = vmatpush.msra.mxu1 %v3189_v54  ;;  %1152 = vmatpush.msra.mxu0 %v2486_v5  ;;  %v3196_v5 = vld [vmem:[#allocation78_spill] sm:$0xff]  ;;  %v3207_v54 = vld [vmem:[#allocation68_spill] sm:$0xff] }
 0x15e   : > { %1060 = vmatpush.msrb.mxu2 %v3190_v44  ;;  %1133 = vmatpush.msrb.mxu3 %v3191_v27 }
 0x15f   : > { %1163 = vmatpush.msra.mxu1 %v3192_v1  ;;  %1153 = vmatpush.msra.mxu0 %v2494_v9  ;;  %v3200_v9 = vld [vmem:[#allocation82_spill] sm:$0xff] }
 0x160   : > { %1061 = vmatpush.msrb.mxu2 %v3193_v23  ;;  %1134 = vmatpush.msrb.mxu3 %v3151_v62  ;;  %v3202_v62 = vld [vmem:[#allocation84_spill] sm:$0xff] }
 0x161   : > { %1164 = vmatpush.msra.mxu1 %v3194_v2  ;;  %1154 = vmatpush.msra.mxu0 %v2502_v12  ;;  %v1466_v12 = vld [vmem:[%s2156_s18 + $0x18] sm:$0xff]  ;;  %v1468_v23 = vld [vmem:[%s2156_s18 + $0x28] sm:$0xff] }
 0x163   : > { %1165 = vmatpush.msra.mxu1 %v3195_v46 }
 0x165   : > { %1166 = vmatpush.msra.mxu1 %v3196_v5 }
 0x167   : > { %1167 = vmatpush.msra.mxu1 %v3197_v0 }
 0x169   : > { %1168 = vmatpush.msra.mxu1 %v3198_v45 }
 0x16b   : > { %1169 = vmatpush.msra.mxu1 %v3199_v37 }
 0x16d   : > { %1170 = vmatpush.msra.mxu1 %v3200_v9 }
 0x16f   : > { %1171 = vmatpush.msra.mxu1 %v2491_v17 }
 0x171   : > { %1172 = vmatpush.msra.mxu1 %v3201_v41  ;;  %v995_v41 = vstv %s994_s23 }
 0x172   : > { %vm996_vm13 = vcmp.lt.s32.totalorder %v995_v41, %v3171_v56 }
 0x173   : > { %1173 = vmatpush.msra.mxu1 %v3202_v62 }
 0x175   : > { %1174 = vmatpush.msra.mxu1 %v3203_v47 }
 0x1a6   : > { %v2787_v1 = vpop.permute.xlu1 %984 }
 0x1bd   : > { %v819_v28 = vpop.f32.mrf.mxu0 }
 0x1be   : > { %v820_v44 = vadd.f32 %v819_v28, %v3207_v54 }
 0x1c2   : > { %v779_v51 = vpop.f32.mrf.mxu2  ;;  %v799_v31 = vpop.f32.mrf.mxu3 }
 0x1c3   : > { %v780_v55 = vadd.f32 %v779_v51, %v3204_v29  ;;  %v800_v53 = vadd.f32 %v799_v31, %v3205_v60  ;;  %v1113_v51 = vsel %vm996_vm13, 1, %v3148_v40 }
 0x1c4   : > { %1115 = vperm.xlu2 %1611, %v1113_v51   ;;  %v1004_v51 = vld [vmem:[%s2166_s20 + $0x8] sm:$0xff] }
 0x1c5   : > { %v822_v35 = vadd.f32 %v1466_v12, %v780_v55  ;;  %v842_v11 = vadd.f32 %v1467_v15, %v800_v53  ;;  %v997_v15 = vstv %s2379_s12 }
 0x1c6   : > { %vm998_vm15 = vcmp.lt.s32.totalorder %v997_v15, %v3171_v56 }
 0x1c7   : > { %v1472_v22 = vmul.f32 -1.442695, %v822_v35  ;;  %v1473_v3 = vmul.f32 -1.442695, %v842_v11 }
 0x1c9   : > { %1632 = vpow2.f32 %v1472_v22  ;;  %v872_v22 = vpop.permute.xlu1 %871 }
 0x1ca   : > { %1634 = vpow2.f32 %v1473_v3  ;;  %vm873_vm2 = vcmp.eq.s32.totalorder %v872_v22, 1 }
 0x1cf   : > { %v1633_v17 = vpop.eup %1632 }
 0x1d0   : > { %v1635_v21 = vpop.eup %1634  ;;  %v826_v24 = vadd.f32 1.0, %v1633_v17 }
 0x1d1   : > { %v846_v4 = vadd.f32 1.0, %v1635_v21 }
 0x1d2   : > { %1636 = vrcp.f32 %v826_v24  ;;  %v838_v49 = vand.u32 2147483648, %v826_v24  ;;  %v836_v32 = vand.u32 2147483647, %v826_v24  ;;  %vm832_vm7 = vweird.f32 %v826_v24 }
 0x1d3   : > { %1638 = vrcp.f32 %v846_v4  ;;  %v892_v26 = vpop.f32.mrf.mxu1  ;;  %v858_v46 = vand.u32 2147483648, %v846_v4  ;;  %vm852_vm11 = vweird.f32 %v846_v4  ;;  %v856_v0 = vand.u32 2147483647, %v846_v4 }
 0x1d4   : > { %v893_v38 = vadd.f32 %v892_v26, %v3206_v6  ;;  %v839_v50 = vor.u32 1.1754944e-38, %v838_v49  ;;  %vm837_vm9 = vcmp.eq.f32.partialorder %v836_v32, 8.507059e+37 }
 0x1d5   : > { %v859_v12 = vor.u32 1.1754944e-38, %v858_v46  ;;  %vm857_vm14 = vcmp.eq.f32.partialorder %v856_v0, 8.507059e+37  ;;  %v1479_v46 = vld [vmem:[%s2156_s18 + $0x38] sm:$0xff] }
 0x1d6   : > { %v935_v30 = vadd.f32 %v1469_v58, %v893_v38 }
 0x1d8   : > { %v1637_v10 = vpop.eup %1636  ;;  %v1474_v48 = vmul.f32 -1.442695, %v935_v30 }
 0x1d9   : > { %v1639_v34 = vpop.eup %1638  ;;  %v828_v59 = vmul.f32 %v1637_v10, %v826_v24  ;;  %v912_v18 = vpop.f32.mrf.mxu2  ;;  %vm833_vm6 = vweird.f32 %v1637_v10 }
 0x1da   : > { %1640 = vpow2.f32 %v1474_v48  ;;  %v913_v25 = vadd.f32 %v912_v18, %v2664_v63  ;;  %v848_v39 = vmul.f32 %v1639_v34, %v846_v4  ;;  %vm834_vm8 = vmor %vm832_vm7, %vm833_vm6  ;;  %vm853_vm10 = vweird.f32 %v1639_v34  ;;  %v932_v26 = vpop.f32.mrf.mxu3  ;;  %v1471_v18 = vld [vmem:[%s2166_s20 + $0x28] sm:$0xff] }
 0x1db   : > { %v829_v36 = vsub.f32 1.0, %v828_v59  ;;  %vm2791_vm12 = vmor %vm852_vm11, %vm853_vm10  ;;  %v1226_v4 = vsel %vm998_vm15, 1, %v3148_v40  ;;  %v933_v59 = vadd.f32 %v932_v26, %v2690_v33 }
 0x1dc   : > { %v955_v20 = vadd.f32 %v1470_v61, %v913_v25  ;;  %v849_v43 = vsub.f32 1.0, %v848_v39  ;;  %1228 = vperm.xlu2 %1611, %v1226_v4  }
 0x1dd   : > { %v830_v19 = vmul.f32 %v1637_v10, %v829_v36 }
 0x1de   : > { %v1475_v42 = vmul.f32 -1.442695, %v955_v20  ;;  %v850_v7 = vmul.f32 %v1639_v34, %v849_v43 }
 0x1df   : > { %v831_v57 = vadd.f32 %v1637_v10, %v830_v19 }
 0x1e0   : > { %v1641_v8 = vpop.eup %1640  ;;  %1642 = vpow2.f32 %v1475_v42  ;;  %v851_v2 = vadd.f32 %v1639_v34, %v850_v7 }
 0x1e1   : > { %v939_v13 = vadd.f32 1.0, %v1641_v8  ;;  %v835_v52 = vsel %vm834_vm8, %v1637_v10, %v831_v57 }
 0x1e2   : > { %v840_v27 = vsel %vm837_vm9, %v839_v50, %v835_v52  ;;  %v855_v47 = vsel %vm2791_vm12, %v1639_v34, %v851_v2  ;;  %vm986_vm9 = vcmp.eq.s32.totalorder %v2787_v1, 1 }
 0x1e3   : > { %1644 = vrcp.f32 %v939_v13  ;;  %v862_v5 = vmul.f32 %v840_v27, %v820_v44  ;;  %v860_v53 = vsel %vm857_vm14, %v859_v12, %v855_v47  ;;  %v951_v11 = vand.u32 2147483648, %v939_v13 }
 0x1e4   : > { %v865_v3 = vsub.f32 1.0, %v860_v53  ;;  %v949_v24 = vand.u32 2147483647, %v939_v13  ;;  %v867_v30 = vmul.f32 %v860_v53, %v2698_v14  ;;  %vm945_vm1 = vweird.f32 %v939_v13  ;;  %v1003_v53 = vld [vmem:[%s2166_s20] sm:$0xff] }
 0x1e5   : > { %v863_v9 = vadd.f32 %v1468_v23, %v862_v5  ;;  %v952_v56 = vor.u32 1.1754944e-38, %v951_v11  ;;  %v1478_v23 = vld [vmem:[%s2156_s18 + $0x30] sm:$0xff] }
 0x1e6   : > { %v1643_v45 = vpop.eup %1642  ;;  %vm950_vm4 = vcmp.eq.f32.partialorder %v949_v24, 8.507059e+37 }
 0x1e7   : > { %v959_v62 = vadd.f32 1.0, %v1643_v45  ;;  %1646 = vtanh.f32 %v863_v9 }
 0x1e9   : > { %v1645_v31 = vpop.eup %1644  ;;  %1648 = vrcp.f32 %v959_v62  ;;  %v971_v43 = vand.u32 2147483648, %v959_v62  ;;  %v969_v19 = vand.u32 2147483647, %v959_v62  ;;  %vm965_vm6 = vweird.f32 %v959_v62 }
 0x1ea   : > { %v941_v55 = vmul.f32 %v1645_v31, %v939_v13  ;;  %vm946_vm0 = vweird.f32 %v1645_v31 }
 0x1eb   : > { %vm947_vm3 = vmor %vm945_vm1, %vm946_vm0  ;;  %v972_v28 = vor.u32 1.1754944e-38, %v971_v43  ;;  %vm970_vm8 = vcmp.eq.f32.partialorder %v969_v19, 8.507059e+37 }
 0x1ec   : > { %v942_v35 = vsub.f32 1.0, %v941_v55 }
 0x1ed   : > { %v1647_v17 = vpop.eup %1646 }
 0x1ee   : > { %v943_v21 = vmul.f32 %v1645_v31, %v942_v35  ;;  %v866_v38 = vmul.f32 %v1647_v17, %v865_v3 }
 0x1ef   : > { %v1649_v58 = vpop.eup %1648 }
 0x1f0   : > { %v944_v10 = vadd.f32 %v1645_v31, %v943_v21  ;;  %v961_v48 = vmul.f32 %v1649_v58, %v959_v62  ;;  %v868_v34 = vadd.f32 %v867_v30, %v866_v38  ;;  %vm966_vm5 = vweird.f32 %v1649_v58 }
 0x1f1   : > { %vm967_vm7 = vmor %vm965_vm6, %vm966_vm5 }
 0x1f2   : > { %v948_v61 = vsel %vm947_vm3, %v1645_v31, %v944_v10  ;;  %v962_v40 = vsub.f32 1.0, %v961_v48  ;;  %v2806_v39 = vsel %vm873_vm2, %v868_v34, %v2698_v14  ;;  %v988_v36 = vsel %vm873_vm2, %v868_v34, 0.0 }
 0x1f3   : > { %v953_v25 = vsel %vm950_vm4, %v952_v56, %v948_v61  ;;  %1476 = vst [vmem:[%s2177_s29 + $0x8] sm:$0xff] %v988_v36  ;;  %1022 = vmatmul.f32.vlgmr.msrb.gmra.mxu0 %v2806_v39  ;;  %1042 = vmatmul.f32.vlgmr.msrb.gmra.mxu1 %v2806_v39 }
 0x1f4   : > { %v975_v49 = vmul.f32 %v953_v25, %v933_v59  ;;  %v963_v20 = vmul.f32 %v1649_v58, %v962_v40  ;;  %1062 = vmatmul.f32.vlgmr.msrb.gmra.mxu2 %v2806_v39  ;;  %v1480_v40 = vld [vmem:[%s2156_s18 + $0x40] sm:$0xff] }
 0x1f6   : > { %v976_v32 = vadd.f32 %v1471_v18, %v975_v49  ;;  %v964_v42 = vadd.f32 %v1649_v58, %v963_v20 }
 0x1f8   : > { %1650 = vtanh.f32 %v976_v32  ;;  %v968_v14 = vsel %vm967_vm7, %v1649_v58, %v964_v42 }
 0x1f9   : > { %v973_v57 = vsel %vm970_vm8, %v972_v28, %v968_v14 }
 0x1fa   : > { %v978_v7 = vsub.f32 1.0, %v973_v57  ;;  %v980_v13 = vmul.f32 %v973_v57, %v2739_v16 }
 0x1fe   : > { %v1651_v8 = vpop.eup %1650 }
 0x1ff   : > { %v979_v50 = vmul.f32 %v1651_v8, %v978_v7 }
 0x201   : > { %v981_v52 = vadd.f32 %v980_v13, %v979_v50 }
 0x203   : > { %v2815_v44 = vsel %vm986_vm9, %v981_v52, %v2739_v16  ;;  %v991_v27 = vsel %vm986_vm9, %v981_v52, 0.0 }
 0x204   : > { %1477 = vst [vmem:[%s2179_s21 + $0x8] sm:$0xff] %v991_v27  ;;  %1135 = vmatmul.f32.vlgmr.msrb.gmra.mxu3 %v2815_v44  ;;  %1155 = vmatmul.f32.vlgmr.msra.gmra.mxu0 %v2815_v44 }
 0x205   : > { %1175 = vmatmul.f32.vlgmr.msra.gmra.mxu1 %v2815_v44 }
 0x21e   : > { %v1116_v57 = vpop.permute.xlu2 %1115 }
 0x21f   : > { %vm1117_vm2 = vcmp.eq.s32.totalorder %v1116_v57, 1 }
 0x270   : > { %v1023_v2 = vpop.f32.mrf.mxu0  ;;  %v1043_v5 = vpop.f32.mrf.mxu1 }
 0x271   : > { %v1024_v0 = vadd.f32 %v1023_v2, %v3204_v29  ;;  %v1044_v1 = vadd.f32 %v1043_v5, %v3205_v60 }
 0x273   : > { %v1066_v45 = vadd.f32 %v1478_v23, %v1024_v0  ;;  %v1086_v16 = vadd.f32 %v1479_v46, %v1044_v1 }
 0x275   : > { %v1481_v37 = vmul.f32 -1.442695, %v1066_v45  ;;  %v1482_v9 = vmul.f32 -1.442695, %v1086_v16 }
 0x277   : > { %1652 = vpow2.f32 %v1481_v37  ;;  %v1063_v30 = vpop.f32.mrf.mxu2 }
 0x278   : > { %1654 = vpow2.f32 %v1482_v9 }
 0x27d   : > { %v1653_v41 = vpop.eup %1652 }
 0x27e   : > { %v1655_v62 = vpop.eup %1654  ;;  %v1070_v47 = vadd.f32 1.0, %v1653_v41 }
 0x27f   : > { %v1090_v12 = vadd.f32 1.0, %v1655_v62 }
 0x280   : > { %1656 = vrcp.f32 %v1070_v47  ;;  %v1082_v4 = vand.u32 2147483648, %v1070_v47  ;;  %v1080_v38 = vand.u32 2147483647, %v1070_v47  ;;  %vm1076_vm11 = vweird.f32 %v1070_v47 }
 0x281   : > { %v1156_v15 = vpop.f32.mrf.mxu0  ;;  %1658 = vrcp.f32 %v1090_v12  ;;  %v1102_v49 = vand.u32 2147483648, %v1090_v12  ;;  %vm1096_vm15 = vweird.f32 %v1090_v12  ;;  %v1100_v20 = vand.u32 2147483647, %v1090_v12 }
 0x282   : > { %v1157_v31 = vadd.f32 %v1156_v15, %v2664_v63  ;;  %v1083_v34 = vor.u32 1.1754944e-38, %v1082_v4  ;;  %vm1081_vm13 = vcmp.eq.f32.partialorder %v1080_v38, 8.507059e+37  ;;  %v1176_v9 = vpop.f32.mrf.mxu1  ;;  %v1005_v15 = vld [vmem:[%s2166_s20 + $0x10] sm:$0xff] }
 0x283   : > { %v1103_v14 = vor.u32 1.1754944e-38, %v1102_v49  ;;  %vm1101_vm1 = vcmp.eq.f32.partialorder %v1100_v20, 8.507059e+37 }
 0x284   : > { %v1199_v29 = vadd.f32 %v1157_v31, %v1004_v51 }
 0x286   : > { %v1484_v55 = vmul.f32 -1.442695, %v1199_v29  ;;  %v1657_v60 = vpop.eup %1656 }
 0x287   : > { %v1136_v35 = vpop.f32.mrf.mxu3  ;;  %v1659_v11 = vpop.eup %1658  ;;  %v1072_v22 = vmul.f32 %v1657_v60, %v1070_v47  ;;  %vm1077_vm10 = vweird.f32 %v1657_v60 }
 0x288   : > { %1660 = vpow2.f32 %v1484_v55  ;;  %v1137_v3 = vadd.f32 %v1136_v35, %v3206_v6  ;;  %v1092_v17 = vmul.f32 %v1659_v11, %v1090_v12  ;;  %vm1078_vm12 = vmor %vm1076_vm11, %vm1077_vm10  ;;  %v1064_v6 = vadd.f32 %v1063_v30, %v3207_v54 }
 0x289   : > { %v1073_v21 = vsub.f32 1.0, %v1072_v22  ;;  %vm1097_vm14 = vweird.f32 %v1659_v11  ;;  %v1177_v12 = vadd.f32 %v1176_v9, %v2690_v33 }
 0x28a   : > { %v1179_v24 = vadd.f32 %v1137_v3, %v1003_v53  ;;  %v1093_v58 = vsub.f32 1.0, %v1092_v17  ;;  %vm1098_vm0 = vmor %vm1096_vm15, %vm1097_vm14  ;;  %v1229_v17 = vpop.permute.xlu2 %1228 }
 0x28b   : > { %v1074_v26 = vmul.f32 %v1657_v60, %v1073_v21  ;;  %vm1230_vm11 = vcmp.eq.s32.totalorder %v1229_v17, 1 }
 0x28c   : > { %v1483_v63 = vmul.f32 -1.442695, %v1179_v24  ;;  %v1094_v10 = vmul.f32 %v1659_v11, %v1093_v58 }
 0x28d   : > { %v1075_v56 = vadd.f32 %v1657_v60, %v1074_v26 }
 0x28e   : > { %v1661_v48 = vpop.eup %1660  ;;  %1662 = vpow2.f32 %v1483_v63  ;;  %v1095_v25 = vadd.f32 %v1659_v11, %v1094_v10 }
 0x28f   : > { %v2829_v59 = vadd.f32 1.0, %v1661_v48  ;;  %v1079_v61 = vsel %vm1078_vm12, %v1657_v60, %v1075_v56 }
 0x290   : > { %v1084_v18 = vsel %vm1081_vm13, %v1083_v34, %v1079_v61  ;;  %v1099_v42 = vsel %vm1098_vm0, %v1659_v11, %v1095_v25 }
 0x291   : > { %v1106_v36 = vmul.f32 %v1084_v18, %v1064_v6  ;;  %1664 = vrcp.f32 %v2829_v59  ;;  %v1104_v28 = vsel %vm1101_vm1, %v1103_v14, %v1099_v42  ;;  %v1215_v29 = vand.u32 2147483648, %v2829_v59 }
 0x292   : > { %v1109_v7 = vsub.f32 1.0, %v1104_v28  ;;  %v1111_v27 = vmul.f32 %v1104_v28, %v2806_v39  ;;  %vm1209_vm8 = vweird.f32 %v2829_v59  ;;  %v1213_v60 = vand.u32 2147483647, %v2829_v59 }
 0x293   : > { %v1107_v19 = vadd.f32 %v1480_v40, %v1106_v36  ;;  %v1216_v11 = vor.u32 1.1754944e-38, %v1215_v29 }
 0x294   : > { %v1663_v43 = vpop.eup %1662  ;;  %vm1214_vm10 = vcmp.eq.f32.partialorder %v1213_v60, 8.507059e+37 }
 0x295   : > { %v1183_v32 = vadd.f32 1.0, %v1663_v43  ;;  %1666 = vtanh.f32 %v1107_v19 }
 0x297   : > { %1668 = vrcp.f32 %v1183_v32  ;;  %v1665_v54 = vpop.eup %1664  ;;  %v1195_v0 = vand.u32 2147483648, %v1183_v32  ;;  %v1193_v37 = vand.u32 2147483647, %v1183_v32  ;;  %vm1189_vm4 = vweird.f32 %v1183_v32 }
 0x298   : > { %v1205_v8 = vmul.f32 %v1665_v54, %v2829_v59  ;;  %vm1210_vm7 = vweird.f32 %v1665_v54 }
 0x299   : > { %v1196_v47 = vor.u32 1.1754944e-38, %v1195_v0  ;;  %vm1194_vm6 = vcmp.eq.f32.partialorder %v1193_v37, 8.507059e+37  ;;  %vm1211_vm9 = vmor %vm1209_vm8, %vm1210_vm7 }
 0x29a   : > { %v1206_v46 = vsub.f32 1.0, %v1205_v8 }
 0x29b   : > { %v1667_v50 = vpop.eup %1666 }
 0x29c   : > { %v1110_v52 = vmul.f32 %v1667_v50, %v1109_v7  ;;  %v1207_v41 = vmul.f32 %v1665_v54, %v1206_v46 }
 0x29d   : > { %v1669_v13 = vpop.eup %1668 }
 0x29e   : > { %v1185_v23 = vmul.f32 %v1669_v13, %v1183_v32  ;;  %v1112_v2 = vadd.f32 %v1111_v27, %v1110_v52  ;;  %vm1190_vm3 = vweird.f32 %v1669_v13 }
 0x29f   : > { %vm1191_vm5 = vmor %vm1189_vm4, %vm1190_vm3 }
 0x2a0   : > { %v1186_v5 = vsub.f32 1.0, %v1185_v23  ;;  %v1118_v1 = vsel %vm1117_vm2, %v1112_v2, %v2806_v39  ;;  %v1232_v45 = vsel %vm1117_vm2, %v1112_v2, 0.0  ;;  %v1208_v39 = vadd.f32 %v1665_v54, %v1207_v41 }
 0x2a1   : > { %1485 = vst [vmem:[%s2177_s29 + $0x10] sm:$0xff] %v1232_v45 }
 0x2a2   : > { %v1187_v16 = vmul.f32 %v1669_v13, %v1186_v5  ;;  %1237 = vst [vmem:[#allocation2] sm:$0xff] %v1118_v1  ;;  %v1212_v35 = vsel %vm1211_vm9, %v1665_v54, %v1208_v39 }
 0x2a3   : > { %v1217_v33 = vsel %vm1214_vm10, %v1216_v11, %v1212_v35 }
 0x2a4   : > { %v1188_v62 = vadd.f32 %v1669_v13, %v1187_v16  ;;  %v1222_v22 = vsub.f32 1.0, %v1217_v33  ;;  %v1224_v24 = vmul.f32 %v1217_v33, %v2815_v44 }
 0x2a6   : > { %v1192_v51 = vsel %vm1191_vm5, %v1669_v13, %v1188_v62 }
 0x2a7   : > { %v1197_v31 = vsel %vm1194_vm6, %v1196_v47, %v1192_v51 }
 0x2a8   : > { %v1219_v55 = vmul.f32 %v1197_v31, %v1177_v12 }
 0x2aa   : > { %v1220_v53 = vadd.f32 %v1219_v55, %v1005_v15 }
 0x2ac   : > { %1670 = vtanh.f32 %v1220_v53 }
 0x2b2   : > { %v1671_v3 = vpop.eup %1670 }
 0x2b3   : > { %v1223_v21 = vmul.f32 %v1671_v3, %v1222_v22 }
 0x2b5   : > { %v1225_v4 = vadd.f32 %v1224_v24, %v1223_v21  ;;  %1242 = sbr.rel (%p1486_p5) target bundleno = 700 (0x2bc), region = 60 }
 0x2b7   : > { %v1231_v58 = vsel %vm1230_vm11, %v1225_v4, %v2815_v44  ;;  %v1235_v26 = vsel %vm1230_vm11, %v1225_v4, 0.0 }
 0x2b8   : > { %1236 = vst [vmem:[%s2179_s21] sm:$0xff] %v1235_v26 }
 0x2b9   : > { %1238 = vst [vmem:[#allocation2 + $0x8] sm:$0xff] %v1231_v58 }
 0x2ba   : > { %1243 = vst [vmem:[#allocation12] sm:$0xff] %v1118_v1 }
 0x2bb   : > { %1245 = vst [vmem:[#allocation12 + $0x8] sm:$0xff] %v1231_v58 }
 0x2bc PF: > { %s1494_s18 = smul.u32 24, %s486_s9  ;;  %s1282_s20 = sshll.u32 %s2179_s21, 4  ;;  %s1283_s20 = int_to_ptr.vmem [resolvable:$true] %s1282_s20 }
 0x2bd   : > { %s1493_s14 = smul.u32 24, %s2010_s8  ;;  %s1264_s15 = sshll.u32 %s2177_s29, 4  ;;  %s1265_s15 = int_to_ptr.vmem [resolvable:$true] %s1264_s15 }
 0x2be   : > { %s1281_s27 = scalar_lea.hbm %s2926_s6, %s1494_s18  ;;  %s1252_s7 = scalar_lea.sflag [#allocation11], %s321_s0 }
 0x2bf   : > { %s1284_s12 = sshll.u32 %s1281_s27, 4  ;;  %s1782_s26 = scalar_lea.hbm %s2926_s6, 72  ;;  %s1285_s12 = int_to_ptr.hbm [resolvable:$true] %s1284_s12 }
 0x2c0   : > { %s1776_s13 = sshra.s32 %s1285_s12, 4  ;;  %s1777_s13 = int_to_ptr.hbm [resolvable:$true] %s1776_s13 }
 0x2c1   : > { %s1778_s24 = scalar_lea.hbm %s1777_s13, 24  ;;  %p1783_p6 = scmp.lt.s32.totalorder %s1777_s13, %s2926_s6 }
 0x2c2   : > { %p1779_p10 = scmp.ne.s32.totalorder %s1777_s13, %s1778_s24  ;;  %p1784_p12 = scmp.lt.s32.totalorder %s1782_s26, %s1778_s24 }
 0x2c4   : > { %p1780_p4 = pnand %p1779_p10, %p2123_p13  ;;  %p1785_p2 = por %p1784_p12, %p1783_p6 }
 0x2c6   : > { %p1781_p1 = pneg %p1780_p4 }
 0x2c8   : > { %p1786_p11 = pnand %p1785_p2, %p1781_p1 }
 0x2ca   : > { %1789 = shalt.err (!%p1786_p11)
}
 0x2cb   : > { %s1931_s0 = smov 128   ;;  %s1932_s29 = smov 8  }
 0x2cc   : > { %1512 = dma.vmem_to_hbm [thread:$0]  (%p2123_p13), %s1283_s20, 384, %s1285_s12, %s1252_s7, %s1931_s0, %s1931_s0, %s1932_s29  }
 0x2cd   : > { %s1263_s18 = scalar_lea.hbm %s2925_s5, %s1493_s14  ;;  %s1933_s3 = smov [#allocation12]  }
 0x2ce   : > { %s1266_s11 = sshll.u32 %s1263_s18, 4  ;;  %s1296_s27 = sshll.u32 %s1933_s3, 4  ;;  %s1267_s11 = int_to_ptr.hbm [resolvable:$true] %s1266_s11  ;;  %s1297_s27 = int_to_ptr.vmem [resolvable:$true] %s1296_s27 }
 0x2cf   : > { %s1247_s13 = scalar_lea.sflag [#allocation5], %s2152_s19  ;;  %s1804_s24 = sshra.s32 %s1267_s11, 4  ;;  %s1805_s24 = int_to_ptr.hbm [resolvable:$true] %s1804_s24 }
 0x2d0   : > { %s1806_s9 = scalar_lea.hbm %s1805_s24, 24  ;;  %p3210_p7 = scmp.ne.s32.totalorder %s3050_s22, 0 }
 0x2d1   : > { %p1807_p9 = scmp.ne.s32.totalorder %s1805_s24, %s1806_s9  ;;  %s1810_s20 = scalar_lea.hbm %s2925_s5, 72 }
 0x2d2   : > { %p1811_p13 = scmp.lt.s32.totalorder %s1805_s24, %s2925_s5  ;;  %p1812_p5 = scmp.lt.s32.totalorder %s1810_s20, %s1806_s9 }
 0x2d3   : > { %p1808_p3 = pnand %p1807_p9, %p3210_p7 }
 0x2d4   : > { %p1813_p10 = por %p1812_p5, %p1811_p13 }
 0x2d5   : > { %p1809_p8 = pneg %p1808_p3 }
 0x2d7   : > { %p1814_p4 = pnand %p1813_p10, %p1809_p8 }
 0x2d9   : > { %1817 = shalt.err (!%p1814_p4)
}
 0x2da   : > { %1511 = dma.vmem_to_hbm [thread:$0]  (%p3210_p7), %s1265_s15, 384, %s1267_s11, %s1247_s13, %s1931_s0, %s1931_s0, %s1932_s29  }
 0x2db   : > { %s3211_s26 = sld [smem:[#allocation88_spill]]  ;;  %p3212_p1 = scmp.eq.s32.totalorder %s2010_s8, 2 }
 0x2dd   : > { %p3213_p6 = pmov %p3212_p1 }
 0x2e1   : > { %s1298_s30 = sshll.u32 %s3211_s26, 4  ;;  %s1299_s30 = int_to_ptr.hbm [resolvable:$true] %s1298_s30 }
 0x2e2   : > { %1514 = dma.vmem_to_hbm [thread:$0]  (%p3212_p1), %s1297_s27, 256, %s1299_s30, [#allocation11], %s1931_s0, %s1931_s0, %s1932_s29  }
 0x2e3   : > { %1887 = dma.done.wait (%p3213_p6), [#allocation11], 256   ;;  %p3214_p12 = pmov %p3212_p1 }
 0x2e5   : > { %1889 = vsyncadd (%p3214_p12), [#allocation11], 4294967040 }
 0x2e6 PF: > { %s3215_s10 = sld [smem:[#allocation22_spill]] }
 0x2e7   : > { %s3216_s17 = sld [smem:[#allocation20_spill]] }
 0x2ec   : > { %p1544_p2 = scmp.ge.s32.totalorder %s3215_s10, 2 }
 0x2ed   : > { %s1318_s23 = sand.u32 1, %s3216_s17  }
 0x2ee   : > { %p1531_p11 = pnand %p1544_p2, %p2076_p0  ;;  %s1319_s15 = scalar_lea.sflag [#allocation5], %s1318_s23 }
 0x2f0   : > { %p1532_p9 = pneg %p1531_p11 }
 0x2f2   : > { %1891 = dma.done.wait (%p1532_p9), %s1319_s15, 384  }
 0x2f3   : > { %1893 = vsyncadd (%p1532_p9), %s1319_s15, 4294966912  ;;  %s3218_s18 = sadd.s32 4294967294, %s3215_s10   ;;  %s3219_s0 = sld [smem:[#allocation26_spill]] }
 0x2f4   : > { %s1328_s29 = sand.u32 1, %s3218_s18  }
 0x2f5   : > { %s1329_s8 = scalar_lea.sflag [#allocation11], %s1328_s29 }
 0x2f9   : > { %p3220_p7 = scmp.ne.s32.totalorder %s3219_s0, 0 }
 0x2fb   : > { %p1534_p3 = pnand %p1544_p2, %p3220_p7 }
 0x2fd   : > { %p1535_p8 = pneg %p1534_p3 }
 0x2ff   : > { %1895 = dma.done.wait (%p1535_p8), %s1329_s8, 384  }
 0x300   : > { %1897 = vsyncadd (%p1535_p8), %s1329_s8, 4294966912  ;;  %s3221_s30 = sld [smem:[#allocation23_spill]]  ;;  %s3226_s24 = smov %s1904_s25 }
 0x301   : > { %s3222_s11 = sld [smem:[#allocation19_spill]]  ;;  %s3228_s27 = smov %s1916_s28 }
 0x302   : > { %s3223_s26 = sld [smem:[#allocation27_spill]] }
 0x303   : > { %s3224_s3 = sld [smem:[#allocation21_spill]] }
 0x304   : > { %s3225_s29 = sld [smem:[#allocation24_spill]] }
 0x306   : > { %p27_p0 = scmp.ge.s32.totalorder %s3221_s30, 5  }
 0x307   : > { %s3227_s25 = smov %s3222_s11 }
 0x308   :  { %29 = sbr.rel (!%p27_p0) target bundleno = 15 (0xf), region = 147 }
 0x309   : > { %s3229_s28 = smov %s3224_s3 }
 0x30d   :  { %1335 = vsyncpa [#allocation4], 1 }
 0x30e   :  { %1337 = vsyncpa [#allocation4 + $0x1], 1 }
 0x30f   :  { %1338 = vsyncpa [#allocation7], 1 }
 0x310   :  { %1340 = vsyncpa [#allocation7 + $0x1], 1 }
 0x311   :  { %1341 = vsyncpa [#allocation5], 1 }
 0x312   :  { %1343 = vsyncpa [#allocation5 + $0x1], 1 }
 0x313   :  { %1344 = vsyncpa [#allocation11], 1 }
 0x314   :  { %1346 = vsyncpa [#allocation11 + $0x1], 1 }

</bundles_post_ra>
